<compile_context>
chip_gen: v7x
topology: tpu7x:2x2x1
jax: 0.10.0
libtpu: 0.0.40
codegen_flags: <defaults>
</compile_context>

<pallas_src>
import functools

import jax
import jax.numpy as jnp
import numpy as np
from jax.experimental import pallas as pl
from jax.experimental.pallas import tpu as pltpu


def _round_up(x, m):
    return ((x + m - 1) // m) * m


def _invariant_spec(shape, index_map):
    """BlockSpec for a grid-invariant operand: request a single VMEM buffer."""
    try:
        return pl.BlockSpec(shape, index_map, pipeline_mode=pl.Buffered(1))
    except Exception:  # older API without pipeline_mode: fall back to default
        return pl.BlockSpec(shape, index_map)


# ----------------------------- Pallas kernel ------------------------------- #
def _conv_fused_kernel(x_ref, w_ref, scale_ref, shift_ref, o_ref, *,
                       kh, kw, stride, th, w_blk, c_in, leaky_relu):
    # x_ref:     (1, H_pad, W_res, C_in)   bf16 padded image (per-batch resident)
    # w_ref:     (kh*kw*C_in, C_out_pad)   bf16 weights, taps stacked along K
    # scale_ref: (1, C_out_pad)            f32 BN scale (ones if no BN)
    # shift_ref: (1, C_out_pad)            f32 BN shift (zeros if no BN)
    # o_ref:     (th*w_blk, C_out_pad)     f32 output tile (lane-dense)
    r = pl.program_id(1)
    m = th * w_blk
    row0 = pl.multiple_of(r * (th * stride), th * stride)

    if stride == 1:
        # Build the K-stacked LHS (im2col tile) entirely in VMEM: for each
        # kernel row take th+1 input rows at FULL resident width so the reshape
        # (th+1, W_res, C) -> ((th+1)*W_res, C) is contiguous (W_res % 8 == 0);
        # each of the kw width taps is then a static sublane-offset slice of
        # that flat slab.  A single MXU dot contracts K = kh*kw*C_in.
        pieces = []
        for i in range(kh):
            slab = x_ref[0, pl.ds(row0 + i, th + 1), :, :]
            flat = slab.reshape((th + 1) * w_blk, c_in)
            for j in range(kw):
                pieces.append(flat[j:j + m, :])
        lhs = pieces[0] if len(pieces) == 1 else jnp.concatenate(pieces, axis=-1)
        acc = jnp.dot(lhs, w_ref[...], preferred_element_type=jnp.float32)
    else:
        # TODO(synk): strided taps still use a doubly-strided slice per tap;
        # densify by pre-splitting even/odd columns (space-to-depth) in the
        # wrapper for stride-2 layers.
        acc = None
        for i in range(kh):
            for j in range(kw):
                patch = x_ref[0, pl.ds(row0 + i, th, stride),
                              pl.ds(j, w_blk, stride), :]
                a = patch.reshape(m, c_in)
                w_tap = w_ref[(i * kw + j) * c_in:(i * kw + j + 1) * c_in, :]
                d = jnp.dot(a, w_tap, preferred_element_type=jnp.float32)
                acc = d if acc is None else acc + d

    # f32 epilogue: BN scale (kept out of the bf16 weights) + shift + leaky.
    y = acc * scale_ref[...] + shift_ref[...]
    if leaky_relu:
        y = jnp.where(y >= 0, y, 0.2 * y)
    o_ref[...] = y.astype(o_ref.dtype)


# ------------------------------- glue (JAX) -------------------------------- #
def conv2d_module_forward(x_nchw, weight_oihw, *, stride=1, padding=0,
                          bn_params=None, leaky_relu=True, tm_target=1024):
    """Forward pass matching the PyTorch Conv2d module (bias=False conv)."""
    out_c, in_c, kh, kw = weight_oihw.shape
    n, _, h, w = x_nchw.shape
    h_out = (h + 2 * padding - kh) // stride + 1
    w_out = (w + 2 * padding - kw) // stride + 1

    c_out_pad = _round_up(out_c, 128)            # lane-dense output channels

    if stride == 1:
        w_blk = _round_up(w_out + kw - 1, 8)     # resident width == per-row M
        w_res = w_blk
    else:
        w_blk = _round_up(w_out, 8)
        w_res = _round_up((w_blk - 1) * stride + kw, 8)

    # tm_target ~1024 suits v5e/v6e (128 MiB VMEM); drop to ~512 on v7x.
    th = max(1, min(h_out, max(1, tm_target // w_blk)))   # output rows / step
    n_row_blocks = -(-h_out // th)
    h_out_c = n_row_blocks * th
    tm = th * w_blk

    # Padded input extents required by the in-kernel slices.
    if stride == 1:
        h_need = h_out_c + kh            # one headroom row for the flat slab
    else:
        h_need = (h_out_c - 1) * stride + kh
    pad_b = max(0, h_need - (h + padding))
    pad_r = max(0, w_res - (w + padding))
    h_arr = h + padding + pad_b

    # NCHW -> NHWC once at the boundary.
    # TODO(synk): in a full model keep activations NHWC bf16 end-to-end so this
    # transpose/pad/cast (extra HBM passes) only happens at the model boundary.
    x_nhwc = jnp.transpose(x_nchw, (0, 2, 3, 1)).astype(jnp.float32)
    x_p = jnp.pad(x_nhwc, ((0, 0), (padding, pad_b), (padding, pad_r),
                           (0, 0))).astype(jnp.bfloat16)

    # BatchNorm (eval mode): the scale stays f32 in the kernel epilogue; only
    # the running mean is folded into the shift.  Weights remain plain bf16.
    # TODO(synk): training-mode BN (per-batch statistics) is not implemented.
    if bn_params is not None:
        inv_std = 1.0 / jnp.sqrt(bn_params["running_var"] + bn_params["eps"])
        scale = bn_params["gamma"] * inv_std
        shift = bn_params["beta"] - bn_params["running_mean"] * scale
    else:
        scale = jnp.ones((out_c,), jnp.float32)
        shift = jnp.zeros((out_c,), jnp.float32)

    # (O, I, kh, kw) -> (kh, kw, I, O) -> (kh*kw*I, O_pad): taps stacked on K.
    w_t = jnp.transpose(weight_oihw, (2, 3, 1, 0)).astype(jnp.float32)
    w_t = w_t.reshape(kh * kw * in_c, out_c)
    w_p = jnp.pad(w_t, ((0, 0), (0, c_out_pad - out_c))).astype(jnp.bfloat16)
    scale_p = jnp.pad(scale.astype(jnp.float32),
                      (0, c_out_pad - out_c)).reshape(1, c_out_pad)
    shift_p = jnp.pad(shift.astype(jnp.float32),
                      (0, c_out_pad - out_c)).reshape(1, c_out_pad)

    kernel = functools.partial(
        _conv_fused_kernel, kh=kh, kw=kw, stride=stride, th=th,
        w_blk=w_blk, c_in=in_c, leaky_relu=leaky_relu)

    R = n_row_blocks  # closed over by the output index_map

    # Rough VMEM footprint (lane dims pad to 128 in VMEM tiles): double-buffered
    # resident image, single-buffered weights, double-buffered f32 output tile,
    # plus staging for the K-stacked LHS.
    img_vmem = 2 * h_arr * w_res * _round_up(in_c, 128) * 2
    wgt_vmem = kh * kw * in_c * c_out_pad * 2
    out_vmem = 2 * tm * c_out_pad * 4
    lhs_vmem = 2 * tm * _round_up(kh * kw * in_c, 128) * 2
    vmem_limit = int(min(max(img_vmem + wgt_vmem + out_vmem + lhs_vmem
                             + (8 << 20), 32 << 20), 100 << 20))
    # TODO(synk): for very large feature maps (416x416 early YOLO layers on a
    # 64 MiB-VMEM part) the resident whole image no longer fits; switch the
    # input to a double-buffered halo row slab fetched via make_async_copy.

    flops = 2 * n * h_out * w_out * out_c * in_c * kh * kw
    bytes_accessed = (int(np.prod(x_p.shape)) * 2
                      + int(np.prod(w_p.shape)) * 2
                      + n * h_out * w_out * out_c * 4)
    cost = pl.CostEstimate(flops=flops, transcendentals=0,
                           bytes_accessed=bytes_accessed)

    out2d = pl.pallas_call(
        kernel,
        out_shape=jax.ShapeDtypeStruct((n * R * tm, c_out_pad), jnp.float32),
        grid=(n, R),
        in_specs=[
            # whole padded image for batch b; resident across the row-block axis
            pl.BlockSpec((1, h_arr, w_res, in_c), lambda b, r: (b, 0, 0, 0)),
            # grid-invariant operands: single VMEM buffer each
            _invariant_spec((kh * kw * in_c, c_out_pad), lambda b, r: (0, 0)),
            _invariant_spec((1, c_out_pad), lambda b, r: (0, 0)),
            _invariant_spec((1, c_out_pad), lambda b, r: (0, 0)),
        ],
        out_specs=pl.BlockSpec((tm, c_out_pad), lambda b, r: (b * R + r, 0)),
        compiler_params=pltpu.CompilerParams(
            # Shard the batch axis across cores; the row-block axis re-uses the
            # resident image, so keep it "arbitrary".
            dimension_semantics=("parallel", "arbitrary"),
            vmem_limit_bytes=vmem_limit),
        cost_estimate=cost,
    )(x_p, w_p, scale_p, shift_p)

    out = out2d.reshape(n, h_out_c, w_blk, c_out_pad)
    out = out[:, :h_out, :w_out, :out_c]
    return jnp.transpose(out, (0, 3, 1, 2))  # back to NCHW


# ------------------------------- reference --------------------------------- #
def _reference(x_nchw, weight_oihw, stride, padding, bn_params, leaky_relu):
    y = jax.lax.conv_general_dilated(
        x_nchw.astype(jnp.float32),
        weight_oihw.astype(jnp.float32),
        window_strides=(stride, stride),
        padding=[(padding, padding), (padding, padding)],
        dimension_numbers=("NCHW", "OIHW", "NCHW"),
    )
    if bn_params is not None:
        mean = bn_params["running_mean"].reshape(1, -1, 1, 1)
        var = bn_params["running_var"].reshape(1, -1, 1, 1)
        gamma = bn_params["gamma"].reshape(1, -1, 1, 1)
        beta = bn_params["beta"].reshape(1, -1, 1, 1)
        y = (y - mean) / jnp.sqrt(var + bn_params["eps"]) * gamma + beta
    if leaky_relu:
        y = jnp.where(y >= 0, y, 0.2 * y)
    return y


# --------------------------------- main ------------------------------------ #
if __name__ == "__main__":
    key = jax.random.PRNGKey(0)
    k_x, k_w, k_g, k_b, k_m, k_v = jax.random.split(key, 6)

    in_c, out_c, ksize = 4, 8, 3
    x = jax.random.normal(k_x, (2, in_c, 16, 16), dtype=jnp.float32)
    weight = 0.1 * jax.random.normal(k_w, (out_c, in_c, ksize, ksize),
                                     dtype=jnp.float32)

    # --- config 1: module defaults (bn=False, leaky_relu=True), padding=1 ---
    out1 = conv2d_module_forward(x, weight, stride=1, padding=1,
                                 bn_params=None, leaky_relu=True)
    jax.block_until_ready(out1)
    ref1 = _reference(x, weight, 1, 1, None, True)
    # bf16 MXU operands (f32 accumulation) -> tolerance sized for bf16 rounding.
    np.testing.assert_allclose(np.asarray(out1), np.asarray(ref1),
                               rtol=2e-2, atol=2e-2)

    # --- config 2: bn=True (eval-mode stats), leaky_relu=True ---------------
    bn_params = dict(
        gamma=1.0 + 0.1 * jax.random.normal(k_g, (out_c,), jnp.float32),
        beta=0.1 * jax.random.normal(k_b, (out_c,), jnp.float32),
        running_mean=0.1 * jax.random.normal(k_m, (out_c,), jnp.float32),
        running_var=jnp.abs(1.0 + 0.1 * jax.random.normal(k_v, (out_c,),
                                                          jnp.float32)),
        eps=1e-5,
    )
    out2 = conv2d_module_forward(x, weight, stride=1, padding=1,
                                 bn_params=bn_params, leaky_relu=True)
    jax.block_until_ready(out2)
    ref2 = _reference(x, weight, 1, 1, bn_params, True)
    np.testing.assert_allclose(np.asarray(out2), np.asarray(ref2),
                               rtol=2e-2, atol=2e-2)

    print("KERNEL_OK")
</pallas_src>

<mosaic_0001>
module attributes {stable_mosaic.version = 11 : i64} {
  func.func @_conv_fused_kernel(%arg0: i32, %arg1: i32, %arg2: memref<1x19x24x4xbf16, #tpu.memory_space<vmem>>, %arg3: memref<36x128xbf16, #tpu.memory_space<vmem>>, %arg4: memref<1x128xf32, #tpu.memory_space<vmem>>, %arg5: memref<1x128xf32, #tpu.memory_space<vmem>>, %arg6: memref<384x128xf32, #tpu.memory_space<vmem>>) attributes {dimension_semantics = [#tpu.dimension_semantics<parallel>, #tpu.dimension_semantics<arbitrary>], iteration_bounds = array<i64: 2, 1>, scalar_prefetch = 0 : i64, scratch_operands = 0 : i64, tpu.core_type = #tpu.core_type<tc>, window_params = [{transform_indices = @transform_0, window_bounds = array<i64: 1, 19, 24, 4>}, {pipeline_mode = #tpu.pipeline_mode<synchronous>, transform_indices = @transform_1, window_bounds = array<i64: 36, 128>}, {pipeline_mode = #tpu.pipeline_mode<synchronous>, transform_indices = @transform_2, window_bounds = array<i64: 1, 128>}, {pipeline_mode = #tpu.pipeline_mode<synchronous>, transform_indices = @transform_3, window_bounds = array<i64: 1, 128>}, {transform_indices = @transform_4, window_bounds = array<i64: 384, 128>}]} {
    %c16_i32 = arith.constant 16 : i32
    %0 = arith.muli %arg1, %c16_i32 : i32
    %1 = tpu.assume_multiple %0, 16 : i32
    %c0_i32 = arith.constant 0 : i32
    %2 = arith.addi %1, %c0_i32 : i32
    %c0 = arith.constant 0 : index
    %3 = arith.index_cast %2 : i32 to index
    %c0_0 = arith.constant 0 : index
    %c0_1 = arith.constant 0 : index
    %4 = vector.load %arg2[%c0, %3, %c0_0, %c0_1] : memref<1x19x24x4xbf16, #tpu.memory_space<vmem>>, vector<1x17x24x4xbf16>
    %5 = vector.shape_cast %4 : vector<1x17x24x4xbf16> to vector<17x24x4xbf16>
    %6 = vector.shape_cast %5 : vector<17x24x4xbf16> to vector<408x4xbf16>
    %7 = vector.extract_strided_slice %6 {offsets = [0, 0], sizes = [384, 4], strides = [1, 1]} : vector<408x4xbf16> to vector<384x4xbf16>
    %8 = vector.extract_strided_slice %6 {offsets = [1, 0], sizes = [384, 4], strides = [1, 1]} : vector<408x4xbf16> to vector<384x4xbf16>
    %9 = vector.extract_strided_slice %6 {offsets = [2, 0], sizes = [384, 4], strides = [1, 1]} : vector<408x4xbf16> to vector<384x4xbf16>
    %c1_i32 = arith.constant 1 : i32
    %10 = arith.addi %1, %c1_i32 : i32
    %c0_2 = arith.constant 0 : index
    %11 = arith.index_cast %10 : i32 to index
    %c0_3 = arith.constant 0 : index
    %c0_4 = arith.constant 0 : index
    %12 = vector.load %arg2[%c0_2, %11, %c0_3, %c0_4] : memref<1x19x24x4xbf16, #tpu.memory_space<vmem>>, vector<1x17x24x4xbf16>
    %13 = vector.shape_cast %12 : vector<1x17x24x4xbf16> to vector<17x24x4xbf16>
    %14 = vector.shape_cast %13 : vector<17x24x4xbf16> to vector<408x4xbf16>
    %15 = vector.extract_strided_slice %14 {offsets = [0, 0], sizes = [384, 4], strides = [1, 1]} : vector<408x4xbf16> to vector<384x4xbf16>
    %16 = vector.extract_strided_slice %14 {offsets = [1, 0], sizes = [384, 4], strides = [1, 1]} : vector<408x4xbf16> to vector<384x4xbf16>
    %17 = vector.extract_strided_slice %14 {offsets = [2, 0], sizes = [384, 4], strides = [1, 1]} : vector<408x4xbf16> to vector<384x4xbf16>
    %c2_i32 = arith.constant 2 : i32
    %18 = arith.addi %1, %c2_i32 : i32
    %c0_5 = arith.constant 0 : index
    %19 = arith.index_cast %18 : i32 to index
    %c0_6 = arith.constant 0 : index
    %c0_7 = arith.constant 0 : index
    %20 = vector.load %arg2[%c0_5, %19, %c0_6, %c0_7] : memref<1x19x24x4xbf16, #tpu.memory_space<vmem>>, vector<1x17x24x4xbf16>
    %21 = vector.shape_cast %20 : vector<1x17x24x4xbf16> to vector<17x24x4xbf16>
    %22 = vector.shape_cast %21 : vector<17x24x4xbf16> to vector<408x4xbf16>
    %23 = vector.extract_strided_slice %22 {offsets = [0, 0], sizes = [384, 4], strides = [1, 1]} : vector<408x4xbf16> to vector<384x4xbf16>
    %24 = vector.extract_strided_slice %22 {offsets = [1, 0], sizes = [384, 4], strides = [1, 1]} : vector<408x4xbf16> to vector<384x4xbf16>
    %25 = vector.extract_strided_slice %22 {offsets = [2, 0], sizes = [384, 4], strides = [1, 1]} : vector<408x4xbf16> to vector<384x4xbf16>
    %26 = tpu.concatenate %7, %8, %9, %15, %16, %17, %23, %24, %25 in 1 : vector<384x4xbf16>, vector<384x4xbf16>, vector<384x4xbf16>, vector<384x4xbf16>, vector<384x4xbf16>, vector<384x4xbf16>, vector<384x4xbf16>, vector<384x4xbf16>, vector<384x4xbf16> -> vector<384x36xbf16>
    %c0_8 = arith.constant 0 : index
    %c0_9 = arith.constant 0 : index
    %27 = vector.load %arg3[%c0_8, %c0_9] : memref<36x128xbf16, #tpu.memory_space<vmem>>, vector<36x128xbf16>
    %cst = arith.constant dense<0.000000e+00> : vector<384x128xf32>
    %28 = tpu.matmul %26, %27, %cst {dimension_numbers = #tpu.dot_dimension_numbers<[1], [0], [0], [1], [0, 0, 1, 1], [], []>} : vector<384x36xbf16>, vector<36x128xbf16>, vector<384x128xf32> -> vector<384x128xf32>
    %c0_10 = arith.constant 0 : index
    %c0_11 = arith.constant 0 : index
    %29 = vector.load %arg4[%c0_10, %c0_11] : memref<1x128xf32, #tpu.memory_space<vmem>>, vector<1x128xf32>
    %30 = vector.broadcast %29 : vector<1x128xf32> to vector<384x128xf32>
    %31 = arith.mulf %28, %30 : vector<384x128xf32>
    %c0_12 = arith.constant 0 : index
    %c0_13 = arith.constant 0 : index
    %32 = vector.load %arg5[%c0_12, %c0_13] : memref<1x128xf32, #tpu.memory_space<vmem>>, vector<1x128xf32>
    %33 = vector.broadcast %32 : vector<1x128xf32> to vector<384x128xf32>
    %34 = arith.addf %31, %33 : vector<384x128xf32>
    %cst_14 = arith.constant 0.000000e+00 : f32
    %35 = vector.broadcast %cst_14 : f32 to vector<384x128xf32>
    %36 = arith.cmpf oge, %34, %35 : vector<384x128xf32>
    %cst_15 = arith.constant 2.000000e-01 : f32
    %37 = vector.broadcast %cst_15 : f32 to vector<384x128xf32>
    %38 = arith.mulf %37, %34 : vector<384x128xf32>
    %39 = arith.select %36, %34, %38 : vector<384x128xi1>, vector<384x128xf32>
    %c0_16 = arith.constant 0 : index
    %c0_17 = arith.constant 0 : index
    %40 = vector.load %arg6[%c0_16, %c0_17] : memref<384x128xf32, #tpu.memory_space<vmem>>, vector<384x128xf32>
    tpu.vector_store %arg6[%c0_16, %c0_17], %39 {strides = array<i32>} : memref<384x128xf32, #tpu.memory_space<vmem>>, vector<384x128xf32>,
    return
  }
  func.func @transform_0(%arg0: i32, %arg1: i32) -> (i32, i32, i32, i32) {
    %c0_i32 = arith.constant 0 : i32
    %c0_i32_0 = arith.constant 0 : i32
    %c0_i32_1 = arith.constant 0 : i32
    %c0_i32_2 = arith.constant 0 : i32
    return %arg0, %c0_i32, %c0_i32_0, %c0_i32_1 : i32, i32, i32, i32
  }
  func.func @transform_1(%arg0: i32, %arg1: i32) -> (i32, i32) {
    %c0_i32 = arith.constant 0 : i32
    %c0_i32_0 = arith.constant 0 : i32
    %c0_i32_1 = arith.constant 0 : i32
    return %c0_i32, %c0_i32_0 : i32, i32
  }
  func.func @transform_2(%arg0: i32, %arg1: i32) -> (i32, i32) {
    %c0_i32 = arith.constant 0 : i32
    %c0_i32_0 = arith.constant 0 : i32
    %c0_i32_1 = arith.constant 0 : i32
    return %c0_i32, %c0_i32_0 : i32, i32
  }
  func.func @transform_3(%arg0: i32, %arg1: i32) -> (i32, i32) {
    %c0_i32 = arith.constant 0 : i32
    %c0_i32_0 = arith.constant 0 : i32
    %c0_i32_1 = arith.constant 0 : i32
    return %c0_i32, %c0_i32_0 : i32, i32
  }
  func.func @transform_4(%arg0: i32, %arg1: i32) -> (i32, i32) {
    %c1_i32 = arith.constant 1 : i32
    %0 = arith.muli %arg0, %c1_i32 : i32
    %1 = arith.addi %0, %arg1 : i32
    %c0_i32 = arith.constant 0 : i32
    %c0_i32_0 = arith.constant 0 : i32
    return %1, %c0_i32 : i32, i32
  }
}

</mosaic_0001>

<bundles_post_ra>
// kernel: tpu_custom_call.1
= control target key start
LH: loop header
LB: loop body
LE: loop exit
PB: predicated region body
PF: predicated region fallthrough
CT: control target
= control target key end

     0   :  { %9 = vsyncpa [#allocation3], 0  ;;  %s5292_s0 = inlined_call_operand.vmem [shape: bf16[2,19,24,4], index: 0, kind: input, shape index: {}]   ;;  %s5293_s1 = inlined_call_operand.vmem [shape: bf16[36,128], index: 1, kind: input, shape index: {}]   ;;  %s5294_s2 = inlined_call_operand.vmem [shape: f32[1,128], index: 2, kind: input, shape index: {}]   ;;  %s5295_s3 = inlined_call_operand.vmem [shape: f32[1,128], index: 3, kind: input, shape index: {}]   ;;  %s5296_s4 = inlined_call_operand.hbm [shape: f32[768,128], index: 4, kind: output, shape index: {}]  }
   0x1   :  { %11 = vsyncpa [#allocation3 + $0x1], 0  ;;  %s3538_s15 = smov 0   ;;  %s3540_s16 = smov 0  }
   0x2   :  { %s3542_s17 = smov 0   ;;  %s3544_s18 = smov 0  }
   0x3   :  { %s3546_s19 = smov 0   ;;  %s3548_s20 = smov 0  }
   0x4 LB: > { %s2950_s21 = sadd.s32 4294967295, %s3501_s20   ;;  %s2951_s22 = sadd.s32 4294967294, %s3501_s20   ;;  %s3501_s20 = sphi %s3548_s20, %s17_s20   ;;  %s3497_s19 = sphi %s3546_s19, %s5368_s19   ;;  %s3493_s18 = sphi %s3544_s18, %s5367_s18   ;;  %s3489_s17 = sphi %s3542_s17, %s5366_s17   ;;  %s3485_s16 = sphi %s3540_s16, %s5365_s16   ;;  %s3481_s15 = sphi %s3538_s15, %s5364_s15  }
   0x5   : > { %s29_s23 = sadd.s32 1, %s3497_s19  ;;  %s127_s24 = sadd.s32 1, %s3489_s17 }
   0x6   : > { %p31_p0 = scmp.ge.s32.totalorder %s29_s23, 2  ;;  %p137_p1 = scmp.ne.s32.totalorder %s3489_s17, %s3485_s16 }
   0x7   : > { %p138_p2 = scmp.eq.s32.totalorder %s2950_s21, 1  ;;  %p143_p3 = scmp.ne.s32.totalorder %s3485_s16, %s3481_s15 }
   0x8   : > { %s5370_s23 = smov (%p31_p0, %s29_s23), 0  ;;  %p144_p5 = scmp.eq.s32.totalorder %s2951_s22, 1 }
   0x9   : > { %p3578_p4 = por %p138_p2, %p137_p1  ;;  %s124_s26 = ssub.s32 %s3497_s19, %s5370_s23 }
   0xa   : > { %p2954_p6 = scmp.ge.s32.totalorder %s3501_s20, 1  ;;  %p125_p7 = scmp.eq.s32.totalorder %s124_s26, 0 }
   0xb   : > { %p3585_p8 = por %p144_p5, %p143_p3  ;;  %p179_p9 = scmp.lt.s32.totalorder %s3501_s20, 3 }
   0xc   : > { %s3591_s28 = scalar_select %p125_p7, %s3489_s17, %s127_s24  }
   0xd   : > { %p180_p10 = pnand %p2954_p6, %p179_p9 }
   0xf   : > { %183 = sbr.rel (%p180_p10) target bundleno = 775 (0x307), region = 36 }
  0x16   : > { %p205_p11 = scmp.lt.s32.totalorder %s3493_s18, 1  ;;  %vm495_vm0 = vsmask.f32 7424  ;;  %s3503_s8 = smov 4   ;;  %vm740_vm1 = vcmask 1046528   ;;  %vm2323_vm2 = vcmask 1041408  }
  0x17   : > { %s3504_s9 = smov 8   ;;  %s3505_s10 = smov 12   ;;  %vm1862_vm3 = vcmask 31744   ;;  %vm1911_vm4 = vcmask 64512   ;;  %vm1960_vm5 = vcmask 97280   ;;  %vm2009_vm6 = vcmask 130048  }
  0x18   : > { %s206_s29 = scalar_select %p205_p11, %s3493_s18, 1  ;;  %vm2058_vm7 = vcmask 162816   ;;  %vm2107_vm8 = vcmask 195584   ;;  %vm2156_vm9 = vcmask 228352   ;;  %vm2205_vm10 = vcmask 261120  }
  0x19   : > { %s3506_s11 = smov 16   ;;  %s3507_s12 = smov 20   ;;  %vm2274_vm11 = vcmask 293888  }
  0x1a   : > { %s3252_s30 = smul.u32 228, %s206_s29  ;;  %s3508_s21 = smov 24  }
  0x1b   : > { %s3510_s5 = smov 32   ;;  %s202_s6 = sand.u32 1, %s3485_s16  }
  0x1c   : > { %s3598_s7 = scalar_lea.vmem %s5292_s0, %s3252_s30  ;;  %s3509_s30 = smov 28  }
  0x1d   : > { %v3601_v0 = vld [vmem:[%s3598_s7 + $0x10] sm:$0xff]   ;;  %v3604_v1 = vld [vmem:[%s3598_s7 + $0x18] sm:$0xff]   ;;  %v3610_v5 = vld [vmem:[%s3598_s7] sm:$0xff]   ;;  %s3161_s14 = smul.u32 6144, %s3493_s18  ;;  %s5245_s26 = scalar_lea.sflag [#allocation3], %s202_s6 }
  0x1e   : > { %v512_v2 = vshll.u32 %v3601_v0, 16  ;;  %v516_v3 = vshrl.u32 %v3601_v0, 16  ;;  %v520_v4 = vshll.u32 %v3604_v1, 16  ;;  %v3613_v6 = vld [vmem:[%s3598_s7 + $0x8] sm:$0xff]   ;;  %v524_v7 = vshrl.u32 %v3604_v1, 16  ;;  %v3619_v12 = vld [vmem:[%s3598_s7 + $0x20] sm:$0xff]  }
  0x1f   : > { %v497_v10 = vshrl.u32 %v3610_v5, 16  ;;  %v499_v11 = vshll.u32 %v3610_v5, 16  ;;  %v3322_v13 = vld [vmem:[%s3598_s7 + $0x28] sm:$0xff]   ;;  %v504_v14 = vshll.u32 %v3613_v6, 16  ;;  %v508_v15 = vshrl.u32 %v3613_v6, 16  ;;  %v3323_v21 = vld [vmem:[%s3598_s7 + $0x30] sm:$0xff]   ;;  %s5237_s24 = scalar_lea.hbm %s5296_s4, %s3161_s14 }
  0x20   : > { %v514_v8 = vrot.slane %v512_v2, 1  ;;  %v522_v9 = vrot.slane %v520_v4, 1  ;;  %v528_v19 = vshll.u32 %v3619_v12, 16  ;;  %v536_v22 = vshll.u32 %v3322_v13, 16  ;;  %v3324_v25 = vld [vmem:[%s3598_s7 + $0x38] sm:$0xff]   ;;  %v3325_v29 = vld [vmem:[%s3598_s7 + $0x40] sm:$0xff]  }
  0x21   : > { %v501_v17 = vrot.slane %v499_v11, 1  ;;  %v506_v20 = vrot.slane %v504_v14, 1  ;;  %v540_v23 = vshrl.u32 %v3322_v13, 16  ;;  %v532_v24 = vshrl.u32 %v3619_v12, 16  ;;  %v3326_v36 = vld [vmem:[%s3598_s7 + $0x48] sm:$0xff]   ;;  %v3327_v45 = vld [vmem:[%s3598_s7 + $0x50] sm:$0xff]  }
  0x22   : > { %v518_v16 = vor.u32 %v516_v3, %v514_v8  ;;  %v526_v18 = vor.u32 %v524_v7, %v522_v9  ;;  %v530_v28 = vrot.slane %v528_v19, 1  ;;  %v538_v31 = vrot.slane %v536_v22, 1  ;;  %v3328_v48 = vld [vmem:[%s3598_s7 + $0x58] sm:$0xff]   ;;  %v3642_v56 = vld [vmem:[%s3598_s7 + $0x60] sm:$0xff]   ;;  %v3645_v58 = vld [vmem:[%s3598_s7 + $0x68] sm:$0xff]  }
  0x23   : > { %v502_v27 = vor.u32 %v501_v17, %v497_v10  ;;  %v510_v30 = vor.u32 %v508_v15, %v506_v20  ;;  %v544_v32 = vshll.u32 %v3323_v21, 16  ;;  %v552_v35 = vshll.u32 %v3324_v25, 16  ;;  %v3649_v61 = vld [vmem:[%s3598_s7 + $0x70] sm:$0xff]   ;;  %v3660_v15 = vld [vmem:[%s3598_s7 + $0x78] sm:$0xff]   ;;  %v3664_v17 = vld [vmem:[%s3598_s7 + $0x88] sm:$0xff]  }
  0x24   : > { %v523_v26 = vsel %vm495_vm0, %v518_v16, %v522_v9  ;;  %v531_v34 = vsel %vm495_vm0, %v526_v18, %v530_v28  ;;  %v542_v37 = vor.u32 %v540_v23, %v538_v31  ;;  %v534_v39 = vor.u32 %v532_v24, %v530_v28 }
  0x25   : > { %696 = vrot.lane.b32.xlu1 %v523_v26, %s3503_s8  ;;  %v507_v33 = vsel %vm495_vm0, %v502_v27, %v506_v20  ;;  %v546_v38 = vrot.slane %v544_v32, 1  ;;  %v556_v40 = vshrl.u32 %v3324_v25, 16  ;;  %v515_v41 = vsel %vm495_vm0, %v510_v30, %v514_v8  ;;  %v3668_v20 = vld [vmem:[%s3598_s7 + $0x80] sm:$0xff]   ;;  %v3675_v25 = vld [vmem:[%s3598_s7 + $0x90] sm:$0xff]  }
  0x26   : > { %692 = vrot.lane.b32.xlu0 %v507_v33, %s3503_s8  ;;  %v554_v42 = vrot.slane %v552_v35, 1  ;;  %v560_v43 = vshll.u32 %v3325_v29, 16  ;;  %v548_v44 = vshrl.u32 %v3323_v21, 16  ;;  %v568_v46 = vshll.u32 %v3326_v36, 16 }
  0x27   : > { %v572_v47 = vshrl.u32 %v3326_v36, 16  ;;  %v547_v49 = vsel %vm495_vm0, %v542_v37, %v546_v38  ;;  %v576_v52 = vshll.u32 %v3327_v45, 16  ;;  %v564_v55 = vshrl.u32 %v3325_v29, 16  ;;  %v3336_v29 = vld [vmem:[%s3598_s7 + $0x98] sm:$0xff]  }
  0x28   : > { %v558_v50 = vor.u32 %v556_v40, %v554_v42  ;;  %v562_v51 = vrot.slane %v560_v43, 1  ;;  %v550_v53 = vor.u32 %v548_v44, %v546_v38  ;;  %v570_v54 = vrot.slane %v568_v46, 1 }
  0x29   : > { %698 = vrot.lane.b32.xlu1 %v531_v34, %s3503_s8  ;;  %v584_v57 = vshll.u32 %v3328_v48, 16  ;;  %v539_v59 = vsel %vm495_vm0, %v534_v39, %v538_v31  ;;  %v588_v60 = vshrl.u32 %v3328_v48, 16  ;;  %v578_v62 = vrot.slane %v576_v52, 1  ;;  %v3337_v39 = vld [vmem:[%s3598_s7 + $0xa0] sm:$0xff]  }
  0x2a   : > { %694 = vrot.lane.b32.xlu0 %v515_v41, %s3503_s8  ;;  %v592_v63 = vshll.u32 %v3642_v56, 16  ;;  %v563_v2 = vsel %vm495_vm0, %v558_v50, %v562_v51  ;;  %v574_v3 = vor.u32 %v572_v47, %v570_v54  ;;  %v600_v7 = vshll.u32 %v3645_v58, 16 }
  0x2b   : > { %v586_v4 = vrot.slane %v584_v57, 1  ;;  %v555_v8 = vsel %vm495_vm0, %v550_v53, %v554_v42  ;;  %v580_v9 = vshrl.u32 %v3327_v45, 16  ;;  %v566_v10 = vor.u32 %v564_v55, %v562_v51  ;;  %v3338_v45 = vld [vmem:[%s3598_s7 + $0xa8] sm:$0xff]   ;;  %v3339_v55 = vld [vmem:[%s3598_s7 + $0xb0] sm:$0xff]  }
  0x2c   : > { %v594_v11 = vrot.slane %v592_v63, 1  ;;  %v604_v13 = vshrl.u32 %v3645_v58, 16  ;;  %v608_v14 = vshll.u32 %v3649_v61, 16  ;;  %v602_v16 = vrot.slane %v600_v7, 1  ;;  %v3341_v7 = vld [vmem:[%s3598_s7 + $0xc0] ss:$0 sps:$4 sm:$0xff]  }
  0x2d   : > { %702 = vrot.lane.b32.xlu1 %v547_v49, %s3503_s8  ;;  %v579_v18 = vsel %vm495_vm0, %v574_v3, %v578_v62  ;;  %v590_v19 = vor.u32 %v588_v60, %v586_v4  ;;  %v616_v21 = vshll.u32 %v3660_v15, 16  ;;  %v582_v22 = vor.u32 %v580_v9, %v578_v62 }
  0x2e   : > { %700 = vrot.lane.b32.xlu0 %v539_v59, %s3503_s8  ;;  %v571_v23 = vsel %vm495_vm0, %v566_v10, %v570_v54  ;;  %v596_v24 = vshrl.u32 %v3642_v56, 16  ;;  %v610_v26 = vrot.slane %v608_v14, 1  ;;  %v620_v27 = vshrl.u32 %v3660_v15, 16  ;;  %v3340_v59 = vld [vmem:[%s3598_s7 + $0xb8] sm:$0xff]  }
  0x2f   : > { %v632_v28 = vshll.u32 %v3664_v17, 16  ;;  %v595_v30 = vsel %vm495_vm0, %v590_v19, %v594_v11  ;;  %v606_v31 = vor.u32 %v604_v13, %v602_v16  ;;  %v618_v32 = vrot.slane %v616_v21, 1 }
  0x30   : > { %v624_v33 = vshll.u32 %v3668_v20, 16  ;;  %v587_v34 = vsel %vm495_vm0, %v582_v22, %v586_v4  ;;  %v598_v35 = vor.u32 %v596_v24, %v594_v11  ;;  %v612_v36 = vshrl.u32 %v3649_v61, 16 }
  0x31   : > { %706 = vrot.lane.b32.xlu1 %v563_v2, %s3503_s8  ;;  %v636_v37 = vshrl.u32 %v3664_v17, 16  ;;  %v640_v38 = vshll.u32 %v3675_v25, 16  ;;  %v634_v40 = vrot.slane %v632_v28, 1  ;;  %v648_v41 = vshll.u32 %v3336_v29, 16 }
  0x32   : > { %704 = vrot.lane.b32.xlu0 %v555_v8, %s3503_s8  ;;  %v611_v42 = vsel %vm495_vm0, %v606_v31, %v610_v26  ;;  %v622_v43 = vor.u32 %v620_v27, %v618_v32  ;;  %v626_v44 = vrot.slane %v624_v33, 1  ;;  %v603_v46 = vsel %vm495_vm0, %v598_v35, %v602_v16 }
  0x33   : > { %v614_v47 = vor.u32 %v612_v36, %v610_v26  ;;  %v628_v48 = vshrl.u32 %v3668_v20, 16  ;;  %v656_v49 = vshll.u32 %v3337_v39, 16  ;;  %v638_v50 = vor.u32 %v636_v37, %v634_v40 }
  0x34   : > { %v642_v51 = vrot.slane %v640_v38, 1  ;;  %v650_v52 = vrot.slane %v648_v41, 1  ;;  %v652_v53 = vshrl.u32 %v3336_v29, 16  ;;  %v627_v54 = vsel %vm495_vm0, %v622_v43, %v626_v44 }
  0x35   : > { %710 = vrot.lane.b32.xlu1 %v579_v18, %s3503_s8  ;;  %v664_v57 = vshll.u32 %v3338_v45, 16  ;;  %v619_v60 = vsel %vm495_vm0, %v614_v47, %v618_v32  ;;  %v630_v62 = vor.u32 %v628_v48, %v626_v44  ;;  %v658_v63 = vrot.slane %v656_v49, 1  ;;  %v3345_v49 = vld [vmem:[%s3598_s7 + $0x14] sm:$0xff]  }
  0x36   : > { %708 = vrot.lane.b32.xlu0 %v571_v23, %s3503_s8  ;;  %v644_v2 = vshrl.u32 %v3675_v25, 16  ;;  %v643_v3 = vsel %vm495_vm0, %v638_v50, %v642_v51  ;;  %v654_v4 = vor.u32 %v652_v53, %v650_v52  ;;  %v668_v9 = vshrl.u32 %v3338_v45, 16  ;;  %v3343_v45 = vld [vmem:[%s3598_s7 + $0xc] sm:$0xff]  }
  0x37   : > { %v666_v8 = vrot.slane %v664_v57, 1  ;;  %v672_v10 = vshll.u32 %v3339_v55, 16  ;;  %v680_v11 = vshll.u32 %v3340_v59, 16  ;;  %v635_v13 = vsel %vm495_vm0, %v630_v62, %v634_v40  ;;  %v3761_v57 = vld [vmem:[%s3598_s7 + $0x1c] sm:$0xff]  }
  0x38   : > { %v646_v14 = vor.u32 %v644_v2, %v642_v51  ;;  %v660_v16 = vshrl.u32 %v3337_v39, 16  ;;  %v659_v18 = vsel %vm495_vm0, %v654_v4, %v658_v63  ;;  %v684_v19 = vshrl.u32 %v3340_v59, 16 }
  0x39   : > { %714 = vrot.lane.b32.xlu1 %v595_v30, %s3503_s8  ;;  %v670_v21 = vor.u32 %v668_v9, %v666_v8  ;;  %v674_v22 = vrot.slane %v672_v10, 1  ;;  %v682_v23 = vrot.slane %v680_v11, 1  ;;  %v688_v24 = vshll.u32 %v3341_v7, 16 }
  0x3a   : > { %712 = vrot.lane.b32.xlu0 %v587_v34, %s3503_s8  ;;  %v651_v26 = vsel %vm495_vm0, %v646_v14, %v650_v52  ;;  %v662_v27 = vor.u32 %v660_v16, %v658_v63  ;;  %v676_v28 = vshrl.u32 %v3339_v55, 16  ;;  %v742_v35 = vrot.slane %v3613_v6, 1 }
  0x3b   : > { %v675_v29 = vsel %vm495_vm0, %v670_v21, %v674_v22  ;;  %v686_v30 = vor.u32 %v684_v19, %v682_v23  ;;  %v690_v31 = vrot.slane %v688_v24, 1  ;;  %v744_v36 = vrot.slane %v3601_v0, 1 }
  0x3c   : > { %v667_v32 = vsel %vm495_vm0, %v662_v27, %v666_v8  ;;  %v678_v33 = vor.u32 %v676_v28, %v674_v22  ;;  %v741_v38 = vrot.slane %v3610_v5, 1  ;;  %v746_v40 = vrot.slane %v3604_v1, 1  ;;  %v3735_v1 = vld [vmem:[%s3598_s7 + $0x6c] sm:$0xff]   ;;  %v3786_v27 = vld [vmem:[%s3598_s7 + $0x78] sm:$0xff]  }
  0x3d   : > { %718 = vrot.lane.b32.xlu1 %v611_v42, %s3503_s8  ;;  %v691_v34 = vsel %vm495_vm0, %v686_v30, %v690_v31  ;;  %v745_v39 = vsel %vm740_vm1, %v742_v35, %v744_v36  ;;  %v748_v6 = vrot.slane %v3619_v12, 1  ;;  %v766_v41 = vrot.slane %v3645_v58, 1  ;;  %v3344_v58 = vld [vmem:[%s3598_s7 + $0x74] sm:$0xff]   ;;  %5315 = vst [vmem:[#allocation5_spill] sm:$0xff] %v3786_v27 }
  0x3e   : > { %716 = vrot.lane.b32.xlu0 %v603_v46, %s3503_s8  ;;  %v683_v37 = vsel %vm495_vm0, %v678_v33, %v682_v23  ;;  %v743_v0 = vsel %vm740_vm1, %v741_v38, %v742_v35  ;;  %v768_v42 = vrot.slane %v3649_v61, 1  ;;  %v747_v43 = vsel %vm740_vm1, %v744_v36, %v746_v40  ;;  %v3794_v30 = vld [vmem:[%s3598_s7 + $0x18] sm:$0xff]   ;;  %v3799_v33 = vld [vmem:[%s3598_s7 + $0x80] sm:$0xff]  }
  0x3f   : > { %v749_v5 = vsel %vm740_vm1, %v746_v40, %v748_v6  ;;  %v5299_v44 = vrot.slane %v3642_v56, 1  ;;  %v1105_v47 = vshll.u32 %v3735_v1, 16  ;;  %v1012_v50 = vshll.u32 %v3343_v45, 16  ;;  %v3808_v36 = vld [vmem:[%s3598_s7 + $0x20] sm:$0xff]  }
  0x40   : > { %v769_v46 = vsel %vm740_vm1, %v766_v41, %v768_v42  ;;  %v1109_v52 = vshrl.u32 %v3735_v1, 16  ;;  %v1113_v53 = vshll.u32 %v3344_v58, 16  ;;  %v1010_v55 = vshrl.u32 %v3343_v45, 16 }
  0x41   : > { %722 = vrot.lane.b32.xlu1 %v627_v54, %s3503_s8  ;;  %v767_v48 = vsel %vm740_vm1, %v5299_v44, %v766_v41  ;;  %v3753_v51 = vrot.slane %v1105_v47, 1  ;;  %v3757_v54 = vld [vmem:[%s3598_s7 + $0x7c] sm:$0xff]   ;;  %v1014_v59 = vrot.slane %v1012_v50, 1  ;;  %v1117_v62 = vshrl.u32 %v3344_v58, 16  ;;  %v3371_v47 = vld [vmem:[%s5293_s1 + $0x8] sm:$0xff]  }
  0x42   : > { %720 = vrot.lane.b32.xlu0 %v619_v60, %s3503_s8  ;;  %v1017_v60 = vshll.u32 %v3345_v49, 16  ;;  %v1115_v2 = vrot.slane %v1113_v53, 1  ;;  %v1021_v4 = vshrl.u32 %v3345_v49, 16  ;;  %v1025_v9 = vshll.u32 %v3761_v57, 16  ;;  %v3370_v41 = vld [vmem:[%s5293_s1] sm:$0xff]  }
  0x43   : > { %v1111_v63 = vor.u32 %v1109_v52, %v3753_v51  ;;  %v1015_v7 = vor.u32 %v1014_v59, %v1010_v55  ;;  %v5298_v21 = vrot.slane %v3735_v1, 1  ;;  %v1278_v22 = vrot.slane %v3344_v58, 1  ;;  %3189 = vmatprep.subr.bf16.mxu0 %v3370_v41  ;;  %3243 = vmatprep.subr.bf16.mxu1 %v3370_v41 }
  0x44   : > { %v1019_v8 = vrot.slane %v1017_v60, 1  ;;  %v1119_v11 = vor.u32 %v1117_v62, %v1115_v2  ;;  %v1253_v24 = vrot.slane %v3343_v45, 1  ;;  %v1524_v40 = vshll.u32 %v3794_v30, 16  ;;  %3190 = vmatpush3.bf16.msra.mxu0 %v3370_v41  ;;  %3246 = vmatpush3.bf16.msra.mxu1 %v3370_v41  ;;  %v3372_v62 = vld [vmem:[%s5293_s1 + $0x10] ss:$0 sps:$4 sm:$0x33]  }
  0x45   : > { %726 = vrot.lane.b32.xlu1 %v643_v3, %s3503_s8  ;;  %v1121_v3 = vshll.u32 %v3757_v54, 16  ;;  %v1116_v10 = vsel %vm495_vm0, %v1111_v63, %v1115_v2  ;;  %v1279_v28 = vsel %vm740_vm1, %v5298_v21, %v1278_v22  ;;  %v1629_v50 = vshrl.u32 %v3799_v33, 16  ;;  %3191 = vmatprep.subr.bf16.mxu0 %v3371_v47 }
  0x46   : > { %724 = vrot.lane.b32.xlu0 %v635_v13, %s3503_s8  ;;  %v1020_v14 = vsel %vm495_vm0, %v1015_v7, %v1019_v8  ;;  %v1023_v16 = vor.u32 %v1021_v4, %v1019_v8  ;;  %v1533_v59 = vshrl.u32 %v3808_v36, 16  ;;  %3244 = vmatprep.subr.bf16.mxu1 %v3371_v47  ;;  %v2325_v4 = vsel %vm2323_vm2, %v3372_v62, 0 }
  0x47   : > { %v3771_v13 = vrot.slane %v1121_v3, 1  ;;  %v1029_v41 = vshrl.u32 %v3761_v57, 16 }
  0x48   : > { %3192 = vmatpush3.bf16.msra.mxu0 %v3371_v47  ;;  %3247 = vmatpush3.bf16.msra.mxu1 %v3371_v47 }
  0x49   : > { %730 = vrot.lane.b32.xlu1 %v659_v18, %s3503_s8  ;;  %v3775_v18 = vrot.slane %v1025_v9, 1  ;;  %v1124_v19 = vsel %vm495_vm0, %v1119_v11, %v3771_v13  ;;  %3249 = vmatprep.subr.msk.bf16.mxu0 %vm2323_vm2, %v3372_v62  ;;  %v5297_v11 = vrot.slane %v3786_v27, 1 }
  0x4a   : > { %728 = vrot.lane.b32.xlu0 %v651_v26, %s3503_s8  ;;  %v1254_v26 = vrot.slane %v3345_v49, 1  ;;  %3250 = vmatprep.subr.msk.bf16.mxu1 %vm2323_vm2, %v3372_v62 }
  0x4b   : > { %v1028_v23 = vsel %vm495_vm0, %v1023_v16, %v3775_v18 }
  0x4c   : > { %v1255_v31 = vsel %vm740_vm1, %v1253_v24, %v1254_v26  ;;  %3194 = vmatpush3.bf16.msra.mxu0 %v2325_v4  ;;  %3248 = vmatpush3.bf16.msra.mxu1 %v2325_v4 }
  0x4d   : > { %734 = vrot.lane.b32.xlu1 %v675_v29, %s3503_s8  ;;  %v1280_v29 = vrot.slane %v3757_v54, 1 }
  0x4e   : > { %732 = vrot.lane.b32.xlu0 %v667_v32, %s3503_s8  ;;  %v1256_v32 = vrot.slane %v3761_v57, 1 }
  0x4f   : > { %v1281_v35 = vsel %vm740_vm1, %v1278_v22, %v1280_v29  ;;  %v1766_v22 = vrot.slane %v3808_v36, 1 }
  0x50   : > { %v1257_v38 = vsel %vm740_vm1, %v1254_v26, %v1256_v32 }
  0x51   : > { %738 = vrot.lane.b32.xlu1 %v691_v34, %s3503_s8  ;;  %v1617_v34 = vshll.u32 %v3786_v27, 16 }
  0x52   : > { %736 = vrot.lane.b32.xlu0 %v683_v37, %s3503_s8  ;;  %v1621_v37 = vshrl.u32 %v3786_v27, 16 }
  0x55   : > { %792 = vrot.lane.b32.xlu1 %v745_v39, %s3504_s9  ;;  %v1625_v39 = vshll.u32 %v3799_v33, 16 }
  0x56   : > { %790 = vrot.lane.b32.xlu0 %v743_v0, %s3504_s9  ;;  %v3817_v0 = vld [vmem:[%s3598_s7 + $0x88] sm:$0xff]  }
  0x57   : > { %v1633_v52 = vshll.u32 %v3817_v0, 16  ;;  %v1792_v24 = vrot.slane %v3817_v0, 1 }
  0x59   : > { %796 = vrot.lane.b32.xlu1 %v749_v5, %s3504_s9  ;;  %v3820_v5 = vrot.slane %v1617_v34, 1  ;;  %v3849_v3 = vrot.slane %v1633_v52, 1 }
  0x5a   : > { %794 = vrot.lane.b32.xlu0 %v747_v43, %s3504_s9  ;;  %v1522_v43 = vshrl.u32 %v3794_v30, 16 }
  0x5b   : > { %5316 = vst [vmem:[#allocation6_spill] sm:$0xff] %v3820_v5 }
  0x5d   : > { %816 = vrot.lane.b32.xlu1 %v769_v46, %s3504_s9  ;;  %v1529_v46 = vshll.u32 %v3808_v36, 16 }
  0x5e   : > { %814 = vrot.lane.b32.xlu0 %v767_v48, %s3504_s9  ;;  %v1623_v48 = vor.u32 %v1621_v37, %v3820_v5  ;;  %v3355_v37 = vld [vmem:[%s3598_s7 + $0x24] sm:$0xff]  }
  0x5f   : > { %v1531_v55 = vrot.slane %v1529_v46, 1  ;;  %v1037_v52 = vshrl.u32 %v3355_v37, 16 }
  0x61   : > { %982 = vrot.lane.b32.xlu1 %v3735_v1, %s3505_s10  ;;  %v1535_v8 = vor.u32 %v1533_v59, %v1531_v55 }
  0x62   : > { %958 = vrot.lane.b32.xlu0 %v3343_v45, %s3505_s10  ;;  %v1526_v45 = vrot.slane %v1524_v40, 1  ;;  %v3897_v40 = vld [vmem:[%s3598_s7 + $0x8c] sm:$0xff]  }
  0x63   : > { %v1137_v47 = vshll.u32 %v3897_v40, 16 }
  0x64   : > { %v1527_v53 = vor.u32 %v1526_v45, %v1522_v43  ;;  %v1033_v43 = vshll.u32 %v3355_v37, 16  ;;  %v3902_v45 = vld [vmem:[%s3598_s7 + $0x2c] sm:$0xff]  }
  0x65   : > { %984 = vrot.lane.b32.xlu1 %v3344_v58, %s3505_s10  ;;  %v3829_v58 = vld [vmem:[%s3598_s7 + $0x28] sm:$0xff]  }
  0x66   : > { %960 = vrot.lane.b32.xlu0 %v3345_v49, %s3505_s10  ;;  %v1627_v49 = vrot.slane %v1625_v39, 1  ;;  %v1537_v60 = vshll.u32 %v3829_v58, 16  ;;  %v1532_v7 = vsel %vm495_vm0, %v1527_v53, %v1531_v55  ;;  %v1041_v53 = vshll.u32 %v3902_v45, 16 }
  0x68   : > { %v1628_v63 = vsel %vm495_vm0, %v1623_v48, %v1627_v49  ;;  %v1631_v2 = vor.u32 %v1629_v50, %v1627_v49  ;;  %v3854_v9 = vrot.slane %v1537_v60, 1  ;;  %v1031_v49 = vor.u32 %v1029_v41, %v3775_v18 }
  0x69   : > { %1229 = vrot.lane.b32.xlu1 %v1116_v10, %s3506_s11  ;;  %v1035_v50 = vrot.slane %v1033_v43, 1  ;;  %v3918_v60 = vrot.slane %v1137_v47, 1  ;;  %v1541_v41 = vshrl.u32 %v3829_v58, 16 }
  0x6a   : > { %1205 = vrot.lane.b32.xlu0 %v1020_v14, %s3506_s11  ;;  %v1636_v10 = vsel %vm495_vm0, %v1631_v2, %v3849_v3  ;;  %v1790_v14 = vrot.slane %v3799_v33, 1  ;;  %v1540_v16 = vsel %vm495_vm0, %v1535_v8, %v3854_v9  ;;  %v3924_v2 = vrot.slane %v1041_v53, 1 }
  0x6b   : > { %v1039_v18 = vor.u32 %v1037_v52, %v1035_v50  ;;  %v1543_v53 = vor.u32 %v1541_v41, %v3854_v9 }
  0x6d   : > { %1231 = vrot.lane.b32.xlu1 %v1124_v19, %s3506_s11  ;;  %v1765_v19 = vrot.slane %v3794_v30, 1 }
  0x6e   : > { %1207 = vrot.lane.b32.xlu0 %v1028_v23, %s3506_s11  ;;  %v1791_v23 = vsel %vm740_vm1, %v5297_v11, %v1790_v14 }
  0x6f   : > { %v1767_v26 = vsel %vm740_vm1, %v1765_v19, %v1766_v22 }
  0x71   : > { %1326 = vrot.lane.b32.xlu1 %v1279_v28, %s3507_s12  ;;  %v1768_v28 = vrot.slane %v3829_v58, 1 }
  0x72   : > { %1302 = vrot.lane.b32.xlu0 %v1255_v31, %s3507_s12  ;;  %v770_v31 = vrot.slane %v3660_v15, 1 }
  0x73   : > { %v1769_v34 = vsel %vm740_vm1, %v1766_v22, %v1768_v28 }
  0x74   : > { %v771_v15 = vsel %vm740_vm1, %v768_v42, %v770_v31 }
  0x75   : > { %1328 = vrot.lane.b32.xlu1 %v1281_v35, %s3507_s12 }
  0x76   : > { %1304 = vrot.lane.b32.xlu0 %v1257_v38, %s3507_s12  ;;  %v1125_v38 = vshrl.u32 %v3757_v54, 16 }
  0x78   : > { %v1127_v61 = vor.u32 %v1125_v38, %v3771_v13  ;;  %v3969_v38 = vld [vmem:[%s3598_s7 + $0x98] sm:$0xff]  }
  0x79   : > { %1494 = vrot.lane.b32.xlu1 %v3786_v27, %s3508_s21 }
  0x7a   : > { %1470 = vrot.lane.b32.xlu0 %v3794_v30, %s3508_s21  ;;  %v1793_v30 = vsel %vm740_vm1, %v1790_v14, %v1792_v24  ;;  %v1044_v14 = vsel %vm495_vm0, %v1039_v18, %v3924_v2 }
  0x7d   : > { %1496 = vrot.lane.b32.xlu1 %v3799_v33, %s3508_s21  ;;  %v772_v33 = vrot.slane %v3668_v20, 1 }
  0x7e   : > { %1472 = vrot.lane.b32.xlu0 %v3808_v36, %s3508_s21  ;;  %v3354_v36 = vld [vmem:[%s3598_s7 + $0x84] sm:$0xff]  }
  0x7f   : > { %v773_v35 = vsel %vm740_vm1, %v770_v31, %v772_v33  ;;  %v1129_v39 = vshll.u32 %v3354_v36, 16  ;;  %v1133_v46 = vshrl.u32 %v3354_v36, 16  ;;  %v1282_v8 = vrot.slane %v3354_v36, 1 }
  0x80   : > { %v5304_v31 = vrot.slane %v3902_v45, 1 }
  0x81   : > { %1741 = vrot.lane.b32.xlu1 %v1628_v63, %s3509_s30  ;;  %v1131_v42 = vrot.slane %v1129_v39, 1  ;;  %v1036_v63 = vsel %vm495_vm0, %v1031_v49, %v1035_v50  ;;  %v1283_v22 = vsel %vm740_vm1, %v1280_v29, %v1282_v8  ;;  %v3358_v29 = vld [vmem:[%s3598_s7 + $0x90] sm:$0xff]   ;;  %v1649_v50 = vshll.u32 %v3969_v38, 16 }
  0x82   : > { %1717 = vrot.lane.b32.xlu0 %v1532_v7, %s3509_s30  ;;  %v1645_v49 = vshrl.u32 %v3358_v29, 16 }
  0x83   : > { %v1132_v13 = vsel %vm495_vm0, %v1127_v61, %v1131_v42  ;;  %v1135_v59 = vor.u32 %v1133_v46, %v1131_v42  ;;  %v3976_v61 = vld [vmem:[%s3598_s7 + $0x38] sm:$0xff]  }
  0x85   : > { %1743 = vrot.lane.b32.xlu1 %v1636_v10, %s3509_s30  ;;  %v1140_v7 = vsel %vm495_vm0, %v1135_v59, %v3918_v60 }
  0x86   : > { %1719 = vrot.lane.b32.xlu0 %v1540_v16, %s3509_s30  ;;  %v1258_v16 = vrot.slane %v3355_v37, 1 }
  0x89   : > { %1838 = vrot.lane.b32.xlu1 %v1791_v23, %s3510_s5  ;;  %v5305_v23 = vrot.slane %v3897_v40, 1 }
  0x8a   : > { %1814 = vrot.lane.b32.xlu0 %v1767_v26, %s3510_s5 }
  0x8d   : > { %1840 = vrot.lane.b32.xlu1 %v1793_v30, %s3510_s5  ;;  %v1259_v30 = vsel %vm740_vm1, %v1256_v32, %v1258_v16  ;;  %v3359_v32 = vld [vmem:[%s3598_s7 + $0x30] sm:$0xff]  }
  0x8e   : > { %1816 = vrot.lane.b32.xlu0 %v1769_v34, %s3510_s5  ;;  %v1545_v43 = vshll.u32 %v3359_v32, 16  ;;  %v1549_v59 = vshrl.u32 %v3359_v32, 16  ;;  %v1770_v41 = vrot.slane %v3359_v32, 1 }
  0x91   : > { %820 = vrot.lane.b32.xlu1 %v773_v35, %s3504_s9 }
  0x92   : > { %818 = vrot.lane.b32.xlu0 %v771_v15, %s3504_s9  ;;  %v1637_v15 = vshrl.u32 %v3817_v0, 16 }
  0x94   : > { %v1639_v46 = vor.u32 %v1637_v15, %v3849_v3 }
  0x95   : > { %986 = vrot.lane.b32.xlu1 %v3757_v54, %s3505_s10  ;;  %v1285_v54 = vsel %vm740_vm1, %v1282_v8, %v5305_v23  ;;  %v3994_v8 = vrot.slane %v1649_v50, 1 }
  0x96   : > { %962 = vrot.lane.b32.xlu0 %v3761_v57, %s3505_s10  ;;  %v1261_v57 = vsel %vm740_vm1, %v1258_v16, %v5304_v31 }
  0x97   : > { %v3910_v48 = vpop.permute.xlu1 %696 }
  0x98   : > { %v3914_v55 = vpop.permute.xlu0 %692 }
  0x99   : > { %988 = vrot.lane.b32.xlu1 %v3354_v36, %s3505_s10 }
  0x9a   : > { %964 = vrot.lane.b32.xlu0 %v3355_v37, %s3505_s10  ;;  %v1641_v37 = vshll.u32 %v3358_v29, 16 }
  0x9b   : > { %v3921_v62 = vpop.permute.xlu1 %698 }
  0x9c   : > { %v3926_v4 = vpop.permute.xlu0 %694  ;;  %v1643_v47 = vrot.slane %v1641_v37, 1 }
  0x9d   : > { %1233 = vrot.lane.b32.xlu1 %v1132_v13, %s3506_s11  ;;  %v1547_v13 = vrot.slane %v1545_v43, 1 }
  0x9e   : > { %1209 = vrot.lane.b32.xlu0 %v1036_v63, %s3506_s11  ;;  %v1553_v63 = vshll.u32 %v3976_v61, 16  ;;  %v1644_v3 = vsel %vm495_vm0, %v1639_v46, %v1643_v47 }
  0x9f   : > { %v3932_v10 = vpop.permute.xlu1 %702  ;;  %v1548_v16 = vsel %vm495_vm0, %v1543_v53, %v1547_v13  ;;  %v1551_v9 = vor.u32 %v1549_v59, %v1547_v13 }
  0xa0   : > { %v3936_v19 = vpop.permute.xlu0 %700 }
  0xa1   : > { %1235 = vrot.lane.b32.xlu1 %v1140_v7, %s3506_s11  ;;  %v1647_v7 = vor.u32 %v1645_v49, %v1643_v47  ;;  %v5303_v47 = vrot.slane %v3969_v38, 1  ;;  %v1771_v49 = vsel %vm740_vm1, %v1768_v28, %v1770_v41  ;;  %v4040_v28 = vld [vmem:[%s3598_s7 + $0x28] sm:$0xff]  }
  0xa2   : > { %1211 = vrot.lane.b32.xlu0 %v1044_v14, %s3506_s11  ;;  %v750_v13 = vrot.slane %v4040_v28, 1 }
  0xa3   : > { %v3944_v26 = vpop.permute.xlu1 %706 }
  0xa4   : > { %5317 = vst [vmem:[#allocation7_spill] sm:$0xff] %v3944_v26  ;;  %v3950_v34 = vpop.permute.xlu0 %704 }
  0xa5   : > { %5318 = vst [vmem:[#allocation8_spill] sm:$0xff] %v3950_v34  ;;  %1330 = vrot.lane.b32.xlu1 %v1283_v22, %s3507_s12  ;;  %v4000_v22 = vrot.slane %v1553_v63, 1  ;;  %v5301_v63 = vrot.slane %v3675_v25, 1 }
  0xa6   : > { %1306 = vrot.lane.b32.xlu0 %v1259_v30, %s3507_s12 }
  0xa7   : > { %v3958_v35 = vpop.permute.xlu1 %710  ;;  %v1556_v37 = vsel %vm495_vm0, %v1551_v9, %v4000_v22 }
  0xa8   : > { %5319 = vst [vmem:[#allocation9_spill] sm:$0xff] %v3958_v35  ;;  %v3964_v36 = vpop.permute.xlu0 %708 }
  0xa9   : > { %5320 = vst [vmem:[#allocation10_spill] sm:$0xff] %v3964_v36  ;;  %1332 = vrot.lane.b32.xlu1 %v1285_v54, %s3507_s12  ;;  %v1652_v54 = vsel %vm495_vm0, %v1647_v7, %v3994_v8  ;;  %v751_v7 = vsel %vm740_vm1, %v748_v6, %v750_v13 }
  0xaa   : > { %1308 = vrot.lane.b32.xlu0 %v1261_v57, %s3507_s12  ;;  %v1794_v57 = vrot.slane %v3358_v29, 1 }
  0xab   : > { %v3972_v39 = vpop.permute.xlu1 %714 }
  0xac   : > { %5321 = vst [vmem:[#allocation11_spill] sm:$0xff] %v3972_v39  ;;  %v3978_v42 = vpop.permute.xlu0 %712  ;;  %v1795_v46 = vsel %vm740_vm1, %v1792_v24, %v1794_v57  ;;  %v774_v24 = vrot.slane %v3664_v17, 1 }
  0xad   : > { %5322 = vst [vmem:[#allocation12_spill] sm:$0xff] %v3978_v42  ;;  %1498 = vrot.lane.b32.xlu1 %v3817_v0, %s3508_s21  ;;  %v1797_v0 = vsel %vm740_vm1, %v1794_v57, %v5303_v47  ;;  %v3363_v57 = vld [vmem:[%s3598_s7 + $0x34] sm:$0xff]  }
  0xae   : > { %1474 = vrot.lane.b32.xlu0 %v3829_v58, %s3508_s21  ;;  %v775_v17 = vsel %vm740_vm1, %v772_v33, %v774_v24  ;;  %v777_v20 = vsel %vm740_vm1, %v774_v24, %v5301_v63  ;;  %v3362_v33 = vld [vmem:[%s3598_s7 + $0x94] sm:$0xff]   ;;  %v1045_v24 = vshrl.u32 %v3902_v45, 16  ;;  %v1053_v63 = vshrl.u32 %v3363_v57, 16 }
  0xaf   : > { %v3986_v52 = vpop.permute.xlu1 %718  ;;  %v1149_v11 = vshrl.u32 %v3362_v33, 16 }
  0xb0   : > { %v3990_v18 = vpop.permute.xlu0 %716  ;;  %v1047_v44 = vor.u32 %v1045_v24, %v3924_v2 }
  0xb1   : > { %1500 = vrot.lane.b32.xlu1 %v3358_v29, %s3508_s21 }
  0xb2   : > { %1476 = vrot.lane.b32.xlu0 %v3359_v32, %s3508_s21  ;;  %v5302_v32 = vrot.slane %v3976_v61, 1 }
  0xb3   : > { %v3997_v14 = vpop.permute.xlu1 %722 }
  0xb4   : > { %v4002_v30 = vpop.permute.xlu0 %720  ;;  %v1773_v58 = vsel %vm740_vm1, %v1770_v41, %v5302_v32  ;;  %v1141_v41 = vshrl.u32 %v3897_v40, 16 }
  0xb5   : > { %1745 = vrot.lane.b32.xlu1 %v1644_v3, %s3509_s30 }
  0xb6   : > { %1721 = vrot.lane.b32.xlu0 %v1548_v16, %s3509_s30  ;;  %v4057_v16 = vld [vmem:[%s3598_s7 + $0x30] sm:$0xff]  }
  0xb7   : > { %v4008_v15 = vpop.permute.xlu1 %726  ;;  %v5300_v9 = vrot.slane %v4057_v16, 1 }
  0xb8   : > { %v4012_v43 = vpop.permute.xlu0 %724 }
  0xb9   : > { %1747 = vrot.lane.b32.xlu1 %v1652_v54, %s3509_s30  ;;  %v753_v6 = vsel %vm740_vm1, %v750_v13, %v5300_v9 }
  0xba   : > { %1723 = vrot.lane.b32.xlu0 %v1556_v37, %s3509_s30 }
  0xbb   : > { %v4020_v29 = vpop.permute.xlu1 %730 }
  0xbc   : > { %5323 = vst [vmem:[#allocation13_spill] sm:$0xff] %v4020_v29  ;;  %v4026_v50 = vpop.permute.xlu0 %728 }
  0xbd   : > { %5324 = vst [vmem:[#allocation14_spill] sm:$0xff] %v4026_v50  ;;  %1842 = vrot.lane.b32.xlu1 %v1795_v46, %s3510_s5  ;;  %v1145_v46 = vshll.u32 %v3362_v33, 16 }
  0xbe   : > { %1818 = vrot.lane.b32.xlu0 %v1771_v49, %s3510_s5  ;;  %v4079_v49 = vld [vmem:[%s3598_s7 + $0x9c] sm:$0xff]  }
  0xbf   : > { %v4034_v53 = vpop.permute.xlu1 %734  ;;  %v1153_v21 = vshll.u32 %v4079_v49, 16 }
  0xc0   : > { %5325 = vst [vmem:[#allocation15_spill] sm:$0xff] %v4034_v53  ;;  %v4043_v59 = vpop.permute.xlu0 %732 }
  0xc1   : > { %5326 = vst [vmem:[#allocation16_spill] sm:$0xff] %v4043_v59  ;;  %1844 = vrot.lane.b32.xlu1 %v1797_v0, %s3510_s5 }
  0xc2   : > { %1820 = vrot.lane.b32.xlu0 %v1773_v58, %s3510_s5  ;;  %v1049_v58 = vshll.u32 %v3363_v57, 16 }
  0xc3   : > { %v4051_v3 = vpop.permute.xlu1 %738 }
  0xc4   : > { %5327 = vst [vmem:[#allocation17_spill] sm:$0xff] %v4051_v3  ;;  %v4060_v54 = vpop.permute.xlu0 %736  ;;  %v1051_v9 = vrot.slane %v1049_v58, 1 }
  0xc5   : > { %5328 = vst [vmem:[#allocation18_spill] sm:$0xff] %v4060_v54  ;;  %822 = vrot.lane.b32.xlu1 %v775_v17, %s3504_s9  ;;  %v4086_v17 = vld [vmem:[%s3598_s7 + $0x3c] sm:$0xff]  }
  0xc6   : > { %798 = vrot.lane.b32.xlu0 %v751_v7, %s3504_s9  ;;  %v1143_v7 = vor.u32 %v1141_v41, %v3918_v60  ;;  %v1057_v32 = vshll.u32 %v4086_v17, 16  ;;  %v1052_v23 = vsel %vm495_vm0, %v1047_v44, %v1051_v9  ;;  %v1055_v2 = vor.u32 %v1053_v63, %v1051_v9 }
  0xc7   : > { %v4068_v12 = vpop.permute.xlu1 %792  ;;  %v1262_v44 = vrot.slane %v3363_v57, 1  ;;  %v5329_v63 = vrot.slane %v3897_v40, 1 }
  0xc8   : > { %v4074_v37 = vpop.permute.xlu0 %790  ;;  %v4110_v24 = vrot.slane %v1057_v32, 1 }
  0xc9   : > { %824 = vrot.lane.b32.xlu1 %v777_v20, %s3504_s9  ;;  %v1147_v20 = vrot.slane %v1145_v46, 1  ;;  %v4104_v46 = vrot.slane %v1153_v21, 1 }
  0xca   : > { %800 = vrot.lane.b32.xlu0 %v753_v6, %s3504_s9 }
  0xcb   : > { %v4082_v0 = vpop.permute.xlu1 %796  ;;  %v1148_v60 = vsel %vm495_vm0, %v1143_v7, %v1147_v20  ;;  %v1151_v41 = vor.u32 %v1149_v11, %v1147_v20  ;;  %v1286_v7 = vrot.slane %v3362_v33, 1  ;;  %v1060_v11 = vsel %vm495_vm0, %v1055_v2, %v4110_v24 }
  0xcc   : > { %v4088_v13 = vpop.permute.xlu0 %794  ;;  %v5330_v20 = vrot.slane %v3902_v45, 1 }
  0xcd   : > { %990 = vrot.lane.b32.xlu1 %v3897_v40, %s3505_s10  ;;  %v1156_v3 = vsel %vm495_vm0, %v1151_v41, %v4104_v46  ;;  %v1287_v9 = vsel %vm740_vm1, %v5329_v63, %v1286_v7 }
  0xce   : > { %966 = vrot.lane.b32.xlu0 %v3902_v45, %s3505_s10 }
  0xcf   : > { %v4096_v6 = vpop.permute.xlu1 %816 }
  0xd0   : > { %v4100_v47 = vpop.permute.xlu0 %814 }
  0xd1   : > { %992 = vrot.lane.b32.xlu1 %v3362_v33, %s3505_s10  ;;  %v5306_v33 = vrot.slane %v4079_v49, 1 }
  0xd2   : > { %968 = vrot.lane.b32.xlu0 %v3363_v57, %s3505_s10  ;;  %v1263_v57 = vsel %vm740_vm1, %v5330_v20, %v1262_v44  ;;  %v4160_v20 = vld [vmem:[%s3598_s7 + $0xa8] sm:$0xff]  }
  0xd3   : > { %v4107_v31 = vpop.permute.xlu1 %982  ;;  %v1289_v40 = vsel %vm740_vm1, %v1286_v7, %v5306_v33  ;;  %v1557_v33 = vshrl.u32 %v3976_v61, 16 }
  0xd4   : > { %v4112_v58 = vpop.permute.xlu0 %958 }
  0xd5   : > { %1237 = vrot.lane.b32.xlu1 %v1148_v60, %s3506_s11  ;;  %v5307_v60 = vrot.slane %v4086_v17, 1  ;;  %v1559_v53 = vor.u32 %v1557_v33, %v4000_v22 }
  0xd6   : > { %1213 = vrot.lane.b32.xlu0 %v1052_v23, %s3506_s11 }
  0xd7   : > { %v4118_v21 = vpop.permute.xlu1 %984  ;;  %v1265_v45 = vsel %vm740_vm1, %v1262_v44, %v5307_v60  ;;  %v4168_v60 = vld [vmem:[%s3598_s7 + $0x48] sm:$0xff]  }
  0xd8   : > { %v4122_v32 = vpop.permute.xlu0 %960  ;;  %v1569_v27 = vshll.u32 %v4168_v60, 16 }
  0xd9   : > { %1239 = vrot.lane.b32.xlu1 %v1156_v3, %s3506_s11  ;;  %v4143_v3 = vld [vmem:[%s3598_s7 + $0xa0] sm:$0xff]  }
  0xda   : > { %1215 = vrot.lane.b32.xlu0 %v1060_v11, %s3506_s11  ;;  %v4152_v11 = vld [vmem:[%s3598_s7 + $0x40] sm:$0xff]   ;;  %v1657_v7 = vshll.u32 %v4143_v3, 16  ;;  %v1661_v54 = vshrl.u32 %v4143_v3, 16 }
  0xdb   : > { %v4130_v23 = vpop.permute.xlu1 %1229  ;;  %v1561_v44 = vshll.u32 %v4152_v11, 16  ;;  %v1565_v35 = vshrl.u32 %v4152_v11, 16 }
  0xdc   : > { %v4136_v41 = vpop.permute.xlu0 %1205  ;;  %v1659_v39 = vrot.slane %v1657_v7, 1 }
  0xdd   : > { %1334 = vrot.lane.b32.xlu1 %v1287_v9, %s3507_s12  ;;  %v1653_v9 = vshrl.u32 %v3969_v38, 16  ;;  %v1563_v36 = vrot.slane %v1561_v44, 1  ;;  %v4194_v44 = vrot.slane %v1569_v27, 1  ;;  %v1774_v27 = vrot.slane %v4152_v11, 1 }
  0xde   : > { %1310 = vrot.lane.b32.xlu0 %v1263_v57, %s3507_s12 }
  0xdf   : > { %v4146_v2 = vpop.permute.xlu1 %1231  ;;  %v1564_v22 = vsel %vm495_vm0, %v1559_v53, %v1563_v36  ;;  %v1567_v33 = vor.u32 %v1565_v35, %v1563_v36  ;;  %v5331_v53 = vrot.slane %v3969_v38, 1 }
  0xe0   : > { %v4154_v63 = vpop.permute.xlu0 %1207 }
  0xe1   : > { %1336 = vrot.lane.b32.xlu1 %v1289_v40, %s3507_s12  ;;  %v1655_v40 = vor.u32 %v1653_v9, %v3994_v8  ;;  %v1663_v9 = vor.u32 %v1661_v54, %v1659_v39  ;;  %v1572_v35 = vsel %vm495_vm0, %v1567_v33, %v4194_v44  ;;  %v5333_v33 = vrot.slane %v3976_v61, 1 }
  0xe2   : > { %1312 = vrot.lane.b32.xlu0 %v1265_v45, %s3507_s12  ;;  %v1665_v45 = vshll.u32 %v4160_v20, 16 }
  0xe3   : > { %v4163_v57 = vpop.permute.xlu1 %1326  ;;  %v1660_v8 = vsel %vm495_vm0, %v1655_v40, %v1659_v39  ;;  %v1798_v39 = vrot.slane %v4143_v3, 1 }
  0xe4   : > { %v4170_v42 = vpop.permute.xlu0 %1302  ;;  %v4189_v7 = vrot.slane %v1665_v45, 1 }
  0xe5   : > { %1502 = vrot.lane.b32.xlu1 %v3969_v38, %s3508_s21  ;;  %v1799_v45 = vsel %vm740_vm1, %v5331_v53, %v1798_v39  ;;  %v1775_v38 = vsel %vm740_vm1, %v5333_v33, %v1774_v27  ;;  %v5334_v33 = vrot.slane %v4160_v20, 1  ;;  %v5335_v53 = vrot.slane %v4168_v60, 1 }
  0xe6   : > { %1478 = vrot.lane.b32.xlu0 %v3976_v61, %s3508_s21  ;;  %v1668_v40 = vsel %vm495_vm0, %v1663_v9, %v4189_v7 }
  0xe7   : > { %v4179_v59 = vpop.permute.xlu1 %1328  ;;  %v1777_v50 = vsel %vm740_vm1, %v1774_v27, %v5335_v53  ;;  %v5338_v53 = vrot.slane %v4057_v16, 1 }
  0xe8   : > { %v4184_v29 = vpop.permute.xlu0 %1304 }
  0xe9   : > { %1504 = vrot.lane.b32.xlu1 %v4143_v3, %s3508_s21 }
  0xea   : > { %1480 = vrot.lane.b32.xlu0 %v4152_v11, %s3508_s21 }
  0xeb   : > { %v1495_v26 = vpop.permute.xlu1 %1494 }
  0xec   : > { %v4196_v34 = vpop.permute.xlu0 %1470 }
  0xed   : > { %1749 = vrot.lane.b32.xlu1 %v1660_v8, %s3509_s30  ;;  %v3399_v8 = vld [vmem:[%s3598_s7 + $0x60] sm:$0xff]  }
  0xee   : > { %1725 = vrot.lane.b32.xlu0 %v1564_v22, %s3509_s30  ;;  %v4218_v22 = vld [vmem:[%s3598_s7 + $0x98] sm:$0xff]  }
  0xef   : > { %v4203_v54 = vpop.permute.xlu1 %1496  ;;  %5332 = vst [vmem:[#allocation19_spill] sm:$0xff] %v4218_v22  ;;  %v778_v11 = vrot.slane %v4218_v22, 1  ;;  %v1801_v22 = vsel %vm740_vm1, %v1798_v39, %v5334_v33 }
  0xf0   : > { %v4208_v36 = vpop.permute.xlu0 %1472 }
  0xf1   : > { %1751 = vrot.lane.b32.xlu1 %v1668_v40, %s3509_s30  ;;  %v4225_v40 = vld [vmem:[%s3598_s7 + $0x38] sm:$0xff]  }
  0xf2   : > { %1727 = vrot.lane.b32.xlu0 %v1572_v35, %s3509_s30  ;;  %v1888_v35 = vsel %vm1862_vm3, %v3399_v8, %v3990_v18  ;;  %v3400_v18 = vld [vmem:[%s3598_s7] sm:$0xff]  }
  0xf3   : > { %v1742_v9 = vpop.permute.xlu1 %1741  ;;  %v1937_v61 = vsel %vm1911_vm4, %v1888_v35, %v4100_v47  ;;  %v1864_v8 = vsel %vm1862_vm3, %v3400_v18, %v3914_v55  ;;  %v5336_v35 = vrot.slane %v3675_v25, 1  ;;  %v5337_v55 = vrot.slane %v4225_v40, 1 }
  0xf4   : > { %v1718_v3 = vpop.permute.xlu0 %1717  ;;  %v1913_v39 = vsel %vm1911_vm4, %v1864_v8, %v4074_v37 }
  0xf5   : > { %1846 = vrot.lane.b32.xlu1 %v1799_v45, %s3510_s5  ;;  %v1986_v45 = vsel %vm1960_vm5, %v1937_v61, %v4107_v31  ;;  %v779_v5 = vsel %vm740_vm1, %v5336_v35, %v778_v11  ;;  %v755_v31 = vsel %vm740_vm1, %v5338_v53, %v5337_v55  ;;  %v1962_v61 = vsel %vm1960_vm5, %v1913_v39, %v4112_v58 }
  0xf6   : > { %1822 = vrot.lane.b32.xlu0 %v1775_v38, %s3510_s5  ;;  %v2035_v27 = vsel %vm2009_vm6, %v1986_v45, %v4130_v23  ;;  %v3401_v38 = vld [vmem:[%s3598_s7 + $0x68] sm:$0xff]   ;;  %v4267_v23 = vld [vmem:[%s3598_s7 + $0xa0] sm:$0xff]   ;;  %v2011_v8 = vsel %vm2009_vm6, %v1962_v61, %v4136_v41 }
  0xf7   : > { %v1744_v47 = vpop.permute.xlu1 %1743  ;;  %v1890_v25 = vsel %vm1862_vm3, %v3401_v38, %v3986_v52  ;;  %v2084_v37 = vsel %vm2058_vm7, %v2035_v27, %v4163_v57  ;;  %v780_v16 = vrot.slane %v4267_v23, 1  ;;  %v4276_v45 = vld [vmem:[%s3598_s7 + $0x40] sm:$0xff]   ;;  %v3404_v57 = vld [vmem:[%s3598_s7 + $0x8] sm:$0xff]   ;;  %v2060_v39 = vsel %vm2058_vm7, %v2011_v8, %v4170_v42 }
  0xf8   : > { %v1720_v33 = vpop.permute.xlu0 %1719  ;;  %v1939_v18 = vsel %vm1911_vm4, %v1890_v25, %v4096_v6  ;;  %v2133_v52 = vsel %vm2107_vm8, %v2084_v37, %v1495_v26  ;;  %v756_v58 = vrot.slane %v4276_v45, 1  ;;  %v3374_v38 = vld [vmem:[%s3598_s7 + $0x44] sm:$0xff]   ;;  %v4334_v37 = vld [vmem:[%s3598_s7 + $0xac] sm:$0xff]  }
  0xf9   : > { %1848 = vrot.lane.b32.xlu1 %v1801_v22, %s3510_s5  ;;  %v1866_v22 = vsel %vm1862_vm3, %v3404_v57, %v3926_v4  ;;  %v1988_v35 = vsel %vm1960_vm5, %v1939_v18, %v4118_v21  ;;  %v2182_v6 = vsel %vm2156_vm9, %v2133_v52, %v1742_v9  ;;  %v2109_v4 = vsel %vm2107_vm8, %v2060_v39, %v4196_v34  ;;  %v4342_v52 = vld [vmem:[%s3598_s7 + $0x4c] sm:$0xff]  }
  0xfa   : > { %1824 = vrot.lane.b32.xlu0 %v1777_v50, %s3510_s5  ;;  %v1915_v41 = vsel %vm1911_vm4, %v1866_v22, %v4068_v12  ;;  %v2037_v27 = vsel %vm2009_vm6, %v1988_v35, %v4146_v2  ;;  %v2158_v50 = vsel %vm2156_vm9, %v2109_v4, %v1718_v3  ;;  %v1065_v8 = vshll.u32 %v3374_v38, 16 }
  0xfb   : > { %v1839_v26 = vpop.permute.xlu1 %1838  ;;  %v1964_v42 = vsel %vm1960_vm5, %v1915_v41, %v4122_v32  ;;  %v2086_v9 = vsel %vm2058_vm7, %v2037_v27, %v4179_v59  ;;  %v781_v59 = vsel %vm740_vm1, %v778_v11, %v780_v16  ;;  %v4311_v32 = vld [vmem:[%s3598_s7 + $0xa4] sm:$0xff]   ;;  %v5339_v11 = vrot.slane %v4225_v40, 1 }
  0xfc   : > { %v2231_v21 = vsel %vm2205_vm10, %v2182_v6, %v1839_v26  ;;  %v1815_v55 = vpop.permute.xlu0 %1814  ;;  %v2013_v12 = vsel %vm2009_vm6, %v1964_v42, %v4154_v63  ;;  %v2135_v34 = vsel %vm2107_vm8, %v2086_v9, %v4203_v54  ;;  %v1161_v61 = vshll.u32 %v4311_v32, 16 }
  0xfd   : > { %826 = vrot.lane.b32.xlu1 %v779_v5, %s3504_s9  ;;  %3219 = vmatprep.mubr.msk.bf16.mxu1 %vm2274_vm11, %v2231_v21  ;;  %v2207_v2 = vsel %vm2205_vm10, %v2158_v50, %v1815_v55  ;;  %v2062_v3 = vsel %vm2058_vm7, %v2013_v12, %v4184_v29  ;;  %v2184_v5 = vsel %vm2156_vm9, %v2135_v34, %v1744_v47  ;;  %v1165_v39 = vshrl.u32 %v4311_v32, 16 }
  0xfe   : > { %802 = vrot.lane.b32.xlu0 %v755_v31, %s3504_s9  ;;  %3195 = vmatprep.mubr.msk.bf16.mxu0 %vm2274_vm11, %v2207_v2  ;;  %v2111_v54 = vsel %vm2107_vm8, %v2062_v3, %v4208_v36  ;;  %v757_v29 = vsel %vm740_vm1, %v5339_v11, %v756_v58  ;;  %v1157_v36 = vshrl.u32 %v4079_v49, 16  ;;  %v1163_v35 = vrot.slane %v1161_v61, 1  ;;  %v4402_v61 = vld [vmem:[%s3598_s7 + $0xb0] sm:$0xff]  }
  0xff   : > { %v1841_v63 = vpop.permute.xlu1 %1840  ;;  %v2160_v47 = vsel %vm2156_vm9, %v2111_v54, %v1720_v33  ;;  %v1061_v33 = vshrl.u32 %v4086_v17, 16  ;;  %v1169_v6 = vshll.u32 %v4334_v37, 16  ;;  %v1067_v27 = vrot.slane %v1065_v8, 1  ;;  %v4411_v8 = vld [vmem:[%s3598_s7 + $0x50] sm:$0xff]  }
 0x100   : > { %v2233_v53 = vsel %vm2205_vm10, %v2184_v5, %v1841_v63  ;;  %v1817_v25 = vpop.permute.xlu0 %1816  ;;  %v1159_v22 = vor.u32 %v1157_v36, %v4104_v46  ;;  %v1069_v4 = vshrl.u32 %v3374_v38, 16  ;;  %v1073_v21 = vshll.u32 %v4342_v52, 16 }
 0x101   : > { %828 = vrot.lane.b32.xlu1 %v781_v59, %s3504_s9  ;;  %3220 = vmatmul.mubr.msk.bf16.vlgmr.msra.gmra.mrb[0].mxu1 %vm2274_vm11, %v2233_v53  ;;  %v2209_v31 = vsel %vm2205_vm10, %v2160_v47, %v1817_v25  ;;  %v1063_v41 = vor.u32 %v1061_v33, %v4110_v24  ;;  %v1167_v9 = vor.u32 %v1165_v39, %v1163_v35  ;;  %v4362_v50 = vrot.slane %v1169_v6, 1  ;;  %v4419_v6 = vld [vmem:[%s3598_s7 + $0xb8] sm:$0xff]  }
 0x102   : > { %804 = vrot.lane.b32.xlu0 %v757_v29, %s3504_s9  ;;  %3196 = vmatmul.mubr.msk.bf16.vlgmr.msra.gmra.mrb[0].mxu0 %vm2274_vm11, %v2209_v31  ;;  %v1164_v46 = vsel %vm495_vm0, %v1159_v22, %v1163_v35  ;;  %v1071_v12 = vor.u32 %v1069_v4, %v1067_v27  ;;  %v4368_v34 = vrot.slane %v1073_v21, 1  ;;  %v1290_v3 = vrot.slane %v4311_v32, 1  ;;  %v4427_v21 = vld [vmem:[%s3598_s7 + $0x58] sm:$0xff]  }
 0x103   : > { %v4338_v18 = vpop.permute.xlu1 %820  ;;  %v1068_v24 = vsel %vm495_vm0, %v1063_v41, %v1067_v27  ;;  %v1172_v59 = vsel %vm495_vm0, %v1167_v9, %v4362_v50  ;;  %v1266_v54 = vrot.slane %v3374_v38, 1  ;;  %v5340_v11 = vrot.slane %v4079_v49, 1 }
 0x104   : > { %v4344_v57 = vpop.permute.xlu0 %818  ;;  %v1076_v63 = vsel %vm495_vm0, %v1071_v12, %v4368_v34  ;;  %v5341_v25 = vrot.slane %v4086_v17, 1  ;;  %v5311_v31 = vrot.slane %v4342_v52, 1  ;;  %v1669_v35 = vshrl.u32 %v4160_v20, 16 }
 0x105   : > { %994 = vrot.lane.b32.xlu1 %v4079_v49, %s3505_s10  ;;  %v1291_v29 = vsel %vm740_vm1, %v5340_v11, %v1290_v3  ;;  %v1673_v39 = vshll.u32 %v4402_v61, 16  ;;  %v1573_v27 = vshrl.u32 %v4168_v60, 16  ;;  %v1577_v4 = vshll.u32 %v4411_v8, 16 }
 0x106   : > { %970 = vrot.lane.b32.xlu0 %v4086_v17, %s3505_s10  ;;  %v1269_v17 = vsel %vm740_vm1, %v1266_v54, %v5311_v31  ;;  %v1671_v9 = vor.u32 %v1669_v35, %v4189_v7  ;;  %v1677_v12 = vshrl.u32 %v4402_v61, 16  ;;  %v1581_v11 = vshrl.u32 %v4411_v8, 16  ;;  %v3407_v31 = vld [vmem:[%s3598_s7 + $0x18] sm:$0xff]  }
 0x107   : > { %v4353_v26 = vpop.permute.xlu1 %986 }
 0x108   : > { %v4357_v42 = vpop.permute.xlu0 %962 }
 0x109   : > { %996 = vrot.lane.b32.xlu1 %v4311_v32, %s3505_s10  ;;  %v5312_v32 = vrot.slane %v4334_v37, 1 }
 0x10a   : > { %972 = vrot.lane.b32.xlu0 %v3374_v38, %s3505_s10  ;;  %v1267_v38 = vsel %vm740_vm1, %v5341_v25, %v1266_v54  ;;  %v1579_v54 = vrot.slane %v1577_v4, 1 }
 0x10b   : > { %v4365_v55 = vpop.permute.xlu1 %988  ;;  %v1293_v49 = vsel %vm740_vm1, %v1290_v3, %v5312_v32  ;;  %v4484_v32 = vld [vmem:[%s3598_s7 + $0xa8] sm:$0xff]  }
 0x10c   : > { %v4370_v2 = vpop.permute.xlu0 %964  ;;  %v1583_v35 = vor.u32 %v1581_v11, %v1579_v54 }
 0x10d   : > { %1241 = vrot.lane.b32.xlu1 %v1164_v46, %s3506_s11 }
 0x10e   : > { %1217 = vrot.lane.b32.xlu0 %v1068_v24, %s3506_s11  ;;  %v1675_v24 = vrot.slane %v1673_v39, 1 }
 0x10f   : > { %v4377_v5 = vpop.permute.xlu1 %1233 }
 0x110   : > { %v4381_v53 = vpop.permute.xlu0 %1209  ;;  %v1676_v7 = vsel %vm495_vm0, %v1671_v9, %v1675_v24  ;;  %v1802_v9 = vrot.slane %v4402_v61, 1 }
 0x111   : > { %1243 = vrot.lane.b32.xlu1 %v1172_v59, %s3506_s11  ;;  %v1681_v59 = vshll.u32 %v4419_v6, 16 }
 0x112   : > { %1219 = vrot.lane.b32.xlu0 %v1076_v63, %s3506_s11  ;;  %v1575_v63 = vor.u32 %v1573_v27, %v4194_v44 }
 0x113   : > { %v4389_v47 = vpop.permute.xlu1 %1235 }
 0x114   : > { %v4395_v36 = vpop.permute.xlu0 %1211  ;;  %v1580_v44 = vsel %vm495_vm0, %v1575_v63, %v1579_v54  ;;  %v1804_v63 = vrot.slane %v4419_v6, 1  ;;  %v3405_v54 = vld [vmem:[%s3598_s7 + $0x70] sm:$0xff]  }
 0x115   : > { %1338 = vrot.lane.b32.xlu1 %v1291_v29, %s3507_s12  ;;  %v1585_v29 = vshll.u32 %v4427_v21, 16  ;;  %v1892_v11 = vsel %vm1862_vm3, %v3405_v54, %v4002_v30  ;;  %v1870_v30 = vsel %vm1862_vm3, %v3407_v31, %v3921_v62  ;;  %v3409_v31 = vld [vmem:[%s3598_s7 + $0x78] sm:$0xff]  }
 0x116   : > { %1314 = vrot.lane.b32.xlu0 %v1267_v38, %s3507_s12  ;;  %v1679_v38 = vor.u32 %v1677_v12, %v1675_v24 }
 0x117   : > { %v4405_v33 = vpop.permute.xlu1 %1330  ;;  %v4451_v39 = vrot.slane %v1585_v29, 1 }
 0x118   : > { %v4413_v22 = vpop.permute.xlu0 %1306 }
 0x119   : > { %1340 = vrot.lane.b32.xlu1 %v1293_v49, %s3507_s12  ;;  %v4444_v49 = vrot.slane %v1681_v59, 1  ;;  %v1588_v12 = vsel %vm495_vm0, %v1583_v35, %v4451_v39  ;;  %v1778_v59 = vrot.slane %v4411_v8, 1 }
 0x11a   : > { %1316 = vrot.lane.b32.xlu0 %v1269_v17, %s3507_s12 }
 0x11b   : > { %v4422_v41 = vpop.permute.xlu1 %1332  ;;  %v1684_v4 = vsel %vm495_vm0, %v1679_v38, %v4444_v49  ;;  %v5342_v38 = vrot.slane %v4160_v20, 1 }
 0x11c   : > { %v4429_v46 = vpop.permute.xlu0 %1308 }
 0x11d   : > { %1506 = vrot.lane.b32.xlu1 %v4160_v20, %s3508_s21  ;;  %v782_v20 = vrot.slane %v4484_v32, 1 }
 0x11e   : > { %1482 = vrot.lane.b32.xlu0 %v4168_v60, %s3508_s21 }
 0x11f   : > { %v1499_v3 = vpop.permute.xlu1 %1498 }
 0x120   : > { %v1475_v25 = vpop.permute.xlu0 %1474 }
 0x121   : > { %1508 = vrot.lane.b32.xlu1 %v4402_v61, %s3508_s21  ;;  %v1780_v61 = vrot.slane %v4427_v21, 1 }
 0x122   : > { %1484 = vrot.lane.b32.xlu0 %v4411_v8, %s3508_s21  ;;  %v1803_v8 = vsel %vm740_vm1, %v5342_v38, %v1802_v9 }
 0x123   : > { %v4448_v17 = vpop.permute.xlu1 %1500 }
 0x124   : > { %v4453_v27 = vpop.permute.xlu0 %1476 }
 0x125   : > { %1753 = vrot.lane.b32.xlu1 %v1676_v7, %s3509_s30  ;;  %v1941_v7 = vsel %vm1911_vm4, %v1892_v11, %v4344_v57  ;;  %v5343_v11 = vrot.slane %v4168_v60, 1  ;;  %v1781_v60 = vsel %vm740_vm1, %v1778_v59, %v1780_v61 }
 0x126   : > { %1729 = vrot.lane.b32.xlu0 %v1580_v44, %s3509_s30  ;;  %v3406_v44 = vld [vmem:[%s3598_s7 + $0x10] sm:$0xff]  }
 0x127   : > { %v1746_v24 = vpop.permute.xlu1 %1745  ;;  %v1868_v35 = vsel %vm1862_vm3, %v3406_v44, %v3910_v48  ;;  %v1779_v62 = vsel %vm740_vm1, %v5343_v11, %v1778_v59  ;;  %v4514_v44 = vld [vmem:[%s3598_s7 + $0x48] sm:$0xff]   ;;  %v4560_v11 = vld [vmem:[%s3598_s7 + $0x50] sm:$0xff]  }
 0x128   : > { %v1722_v29 = vpop.permute.xlu0 %1721  ;;  %v1917_v57 = vsel %vm1911_vm4, %v1868_v35, %v4088_v13 }
 0x129   : > { %1755 = vrot.lane.b32.xlu1 %v1684_v4, %s3509_s30  ;;  %v1990_v4 = vsel %vm1960_vm5, %v1941_v7, %v4353_v26  ;;  %v1805_v26 = vsel %vm740_vm1, %v1802_v9, %v1804_v63  ;;  %v1966_v7 = vsel %vm1960_vm5, %v1917_v57, %v4357_v42  ;;  %v758_v42 = vrot.slane %v4514_v44, 1 }
 0x12a   : > { %1731 = vrot.lane.b32.xlu0 %v1588_v12, %s3509_s30  ;;  %v2039_v48 = vsel %vm2009_vm6, %v1990_v4, %v4377_v5  ;;  %v1894_v12 = vsel %vm1862_vm3, %v3409_v31, %v3997_v14  ;;  %v2015_v9 = vsel %vm2009_vm6, %v1966_v7, %v4381_v53  ;;  %v783_v53 = vsel %vm740_vm1, %v780_v16, %v782_v20 }
 0x12b   : > { %v1748_v54 = vpop.permute.xlu1 %1747  ;;  %v2088_v13 = vsel %vm2058_vm7, %v2039_v48, %v4405_v33  ;;  %v1943_v5 = vsel %vm1911_vm4, %v1894_v12, %v4338_v18  ;;  %v759_v48 = vsel %vm740_vm1, %v756_v58, %v758_v42  ;;  %v3381_v58 = vld [vmem:[%s3598_s7 + $0xb4] sm:$0xff]  }
 0x12c   : > { %v1724_v38 = vpop.permute.xlu0 %1723  ;;  %v2137_v14 = vsel %vm2107_vm8, %v2088_v13, %v1499_v3  ;;  %v1992_v33 = vsel %vm1960_vm5, %v1943_v5, %v4365_v55  ;;  %v1919_v3 = vsel %vm1911_vm4, %v1870_v30, %v4082_v0  ;;  %v3382_v12 = vld [vmem:[%s3598_s7 + $0x54] sm:$0xff]   ;;  %v1173_v13 = vshrl.u32 %v4334_v37, 16 }
 0x12d   : > { %1850 = vrot.lane.b32.xlu1 %v1803_v8, %s3510_s5  ;;  %v2064_v8 = vsel %vm2058_vm7, %v2015_v9, %v4413_v22  ;;  %v2186_v59 = vsel %vm2156_vm9, %v2137_v14, %v1746_v24  ;;  %v2041_v35 = vsel %vm2009_vm6, %v1992_v33, %v4389_v47  ;;  %v1968_v24 = vsel %vm1960_vm5, %v1919_v3, %v4370_v2  ;;  %v4545_v2 = vld [vmem:[%s3598_s7 + $0xb0] sm:$0xff]   ;;  %v4591_v14 = vld [vmem:[%s3598_s7 + $0x5c] sm:$0xff]  }
 0x12e   : > { %1826 = vrot.lane.b32.xlu0 %v1779_v62, %s3510_s5  ;;  %v2113_v55 = vsel %vm2107_vm8, %v2064_v8, %v1475_v25  ;;  %v2090_v4 = vsel %vm2058_vm7, %v2041_v35, %v4422_v41  ;;  %v2017_v0 = vsel %vm2009_vm6, %v1968_v24, %v4395_v36  ;;  %v784_v41 = vrot.slane %v4545_v2, 1 }
 0x12f   : > { %v1843_v18 = vpop.permute.xlu1 %1842  ;;  %v2162_v23 = vsel %vm2156_vm9, %v2113_v55, %v1722_v29  ;;  %v2139_v16 = vsel %vm2107_vm8, %v2090_v4, %v4448_v17  ;;  %v2066_v25 = vsel %vm2058_vm7, %v2017_v0, %v4429_v46  ;;  %v760_v46 = vrot.slane %v4560_v11, 1 }
 0x130   : > { %v2235_v22 = vsel %vm2205_vm10, %v2186_v59, %v1843_v18  ;;  %v1819_v57 = vpop.permute.xlu0 %1818  ;;  %v2188_v29 = vsel %vm2156_vm9, %v2139_v16, %v1748_v54  ;;  %v2115_v17 = vsel %vm2107_vm8, %v2066_v25, %v4453_v27  ;;  %v785_v45 = vsel %vm740_vm1, %v782_v20, %v784_v41 }
 0x131   : > { %1852 = vrot.lane.b32.xlu1 %v1805_v26, %s3510_s5  ;;  %3223 = vmatprep.mubr.msk.bf16.mxu1 %vm2274_vm11, %v2235_v22  ;;  %v2211_v47 = vsel %vm2205_vm10, %v2162_v23, %v1819_v57  ;;  %v2164_v54 = vsel %vm2156_vm9, %v2115_v17, %v1724_v38  ;;  %v761_v31 = vsel %vm740_vm1, %v758_v42, %v760_v46  ;;  %v1177_v20 = vshll.u32 %v3381_v58, 16  ;;  %v4584_v38 = vld [vmem:[%s3598_s7 + $0xbc] sm:$0xff]  }
 0x132   : > { %1828 = vrot.lane.b32.xlu0 %v1781_v60, %s3510_s5  ;;  %3199 = vmatprep.mubr.msk.bf16.mxu0 %vm2274_vm11, %v2211_v47  ;;  %v1077_v5 = vshrl.u32 %v4342_v52, 16  ;;  %v1081_v9 = vshll.u32 %v3382_v12, 16  ;;  %v1175_v33 = vor.u32 %v1173_v13, %v4362_v50  ;;  %v1181_v59 = vshrl.u32 %v3381_v58, 16 }
 0x133   : > { %v1845_v36 = vpop.permute.xlu1 %1844  ;;  %v1179_v8 = vrot.slane %v1177_v20, 1  ;;  %v1185_v18 = vshll.u32 %v4584_v38, 16  ;;  %v1085_v55 = vshrl.u32 %v3382_v12, 16  ;;  %v1089_v22 = vshll.u32 %v4591_v14, 16  ;;  %v4648_v20 = vld [vmem:[%s3598_s7 + $0xc0] sm:$0xff]  }
 0x134   : > { %v2237_v30 = vsel %vm2205_vm10, %v2188_v29, %v1845_v36  ;;  %v1821_v62 = vpop.permute.xlu0 %1820  ;;  %v1079_v3 = vor.u32 %v1077_v5, %v4368_v34  ;;  %v1083_v35 = vrot.slane %v1081_v9, 1  ;;  %v1294_v29 = vrot.slane %v3381_v58, 1  ;;  %v4657_v9 = vld [vmem:[%s3598_s7 + $0x60] sm:$0xff]  }
 0x135   : > { %830 = vrot.lane.b32.xlu1 %v783_v53, %s3504_s9  ;;  %3224 = vmatmul.mubr.msk.bf16.gmra.mrb[4].mxu1 %vm2274_vm11, %v2237_v30  ;;  %v2213_v27 = vsel %vm2205_vm10, %v2164_v54, %v1821_v62  ;;  %v1180_v50 = vsel %vm495_vm0, %v1175_v33, %v1179_v8  ;;  %v1183_v4 = vor.u32 %v1181_v59, %v1179_v8  ;;  %v4609_v23 = vrot.slane %v1185_v18, 1  ;;  %v4665_v18 = vld [vmem:[%s3598_s7 + $0xc8] sm:$0xff]  }
 0x136   : > { %806 = vrot.lane.b32.xlu0 %v759_v48, %s3504_s9  ;;  %3200 = vmatmul.mubr.msk.bf16.gmra.mrb[4].mxu0 %vm2274_vm11, %v2213_v27  ;;  %v1084_v0 = vsel %vm495_vm0, %v1079_v3, %v1083_v35  ;;  %v1087_v34 = vor.u32 %v1085_v55, %v1083_v35  ;;  %v4615_v16 = vrot.slane %v1089_v22, 1  ;;  %v1270_v30 = vrot.slane %v3382_v12, 1  ;;  %v4673_v22 = vld [vmem:[%s3598_s7 + $0x68] sm:$0xff]  }
 0x137   : > { %v4573_v26 = vpop.permute.xlu1 %822  ;;  %v1188_v25 = vsel %vm495_vm0, %v1183_v4, %v4609_v23  ;;  %v5344_v54 = vrot.slane %v4334_v37, 1  ;;  %v1296_v27 = vrot.slane %v4584_v38, 1  ;;  %v1685_v8 = vshrl.u32 %v4419_v6, 16 }
 0x138   : > { %v4579_v7 = vpop.permute.xlu0 %798  ;;  %v1092_v17 = vsel %vm495_vm0, %v1087_v34, %v4615_v16  ;;  %v1689_v59 = vshll.u32 %v4648_v20, 16  ;;  %v1589_v35 = vshrl.u32 %v4427_v21, 16  ;;  %v1593_v55 = vshll.u32 %v4657_v9, 16 }
 0x139   : > { %832 = vrot.lane.b32.xlu1 %v785_v45, %s3504_s9  ;;  %v1295_v62 = vsel %vm740_vm1, %v5344_v54, %v1294_v29  ;;  %v1687_v4 = vor.u32 %v1685_v8, %v4444_v49  ;;  %v1693_v34 = vshrl.u32 %v4648_v20, 16  ;;  %v1597_v54 = vshrl.u32 %v4657_v9, 16 }
 0x13a   : > { %808 = vrot.lane.b32.xlu0 %v761_v31, %s3504_s9 }
 0x13b   : > { %v4587_v60 = vpop.permute.xlu1 %824 }
 0x13c   : > { %v4593_v42 = vpop.permute.xlu0 %800 }
 0x13d   : > { %998 = vrot.lane.b32.xlu1 %v4334_v37, %s3505_s10  ;;  %v1297_v37 = vsel %vm740_vm1, %v1294_v29, %v1296_v27 }
 0x13e   : > { %974 = vrot.lane.b32.xlu0 %v4342_v52, %s3505_s10 }
 0x13f   : > { %v4601_v53 = vpop.permute.xlu1 %990 }
 0x140   : > { %v4605_v24 = vpop.permute.xlu0 %966 }
 0x141   : > { %1000 = vrot.lane.b32.xlu1 %v3381_v58, %s3505_s10  ;;  %v5345_v58 = vrot.slane %v4342_v52, 1 }
 0x142   : > { %976 = vrot.lane.b32.xlu0 %v3382_v12, %s3505_s10  ;;  %v1272_v12 = vrot.slane %v4591_v14, 1 }
 0x143   : > { %v4612_v57 = vpop.permute.xlu1 %992  ;;  %v1271_v31 = vsel %vm740_vm1, %v5345_v58, %v1270_v30 }
 0x144   : > { %v4617_v47 = vpop.permute.xlu0 %968  ;;  %v1273_v52 = vsel %vm740_vm1, %v1270_v30, %v1272_v12  ;;  %v1595_v30 = vrot.slane %v1593_v55, 1 }
 0x145   : > { %1245 = vrot.lane.b32.xlu1 %v1180_v50, %s3506_s11 }
 0x146   : > { %1221 = vrot.lane.b32.xlu0 %v1084_v0, %s3506_s11  ;;  %v1691_v0 = vrot.slane %v1689_v59, 1  ;;  %v1599_v8 = vor.u32 %v1597_v54, %v1595_v30 }
 0x147   : > { %v4623_v36 = vpop.permute.xlu1 %1237 }
 0x148   : > { %v4627_v48 = vpop.permute.xlu0 %1213  ;;  %v1692_v49 = vsel %vm495_vm0, %v1687_v4, %v1691_v0  ;;  %v1806_v4 = vrot.slane %v4648_v20, 1 }
 0x149   : > { %1247 = vrot.lane.b32.xlu1 %v1188_v25, %s3506_s11  ;;  %v1697_v25 = vshll.u32 %v4665_v18, 16 }
 0x14a   : > { %1223 = vrot.lane.b32.xlu0 %v1092_v17, %s3506_s11  ;;  %v1591_v17 = vor.u32 %v1589_v35, %v4451_v39 }
 0x14b   : > { %v4635_v45 = vpop.permute.xlu1 %1239 }
 0x14c   : > { %v4641_v13 = vpop.permute.xlu0 %1215  ;;  %v1596_v39 = vsel %vm495_vm0, %v1591_v17, %v1595_v30  ;;  %v3413_v17 = vld [vmem:[%s3598_s7 + $0x80] sm:$0xff]  }
 0x14d   : > { %1342 = vrot.lane.b32.xlu1 %v1295_v62, %s3507_s12  ;;  %v1601_v62 = vshll.u32 %v4673_v22, 16  ;;  %v1896_v30 = vsel %vm1862_vm3, %v3413_v17, %v4012_v43  ;;  %v4728_v17 = vld [vmem:[%s3598_s7 + $0xb8] sm:$0xff]  }
 0x14e   : > { %1318 = vrot.lane.b32.xlu0 %v1271_v31, %s3507_s12  ;;  %v1695_v31 = vor.u32 %v1693_v34, %v1691_v0 }
 0x14f   : > { %v4651_v5 = vpop.permute.xlu1 %1334  ;;  %v4695_v59 = vrot.slane %v1601_v62, 1  ;;  %v1808_v62 = vrot.slane %v4665_v18, 1 }
 0x150   : > { %v4659_v33 = vpop.permute.xlu0 %1310 }
 0x151   : > { %1344 = vrot.lane.b32.xlu1 %v1297_v37, %s3507_s12  ;;  %v4690_v37 = vrot.slane %v1697_v25, 1  ;;  %v1604_v34 = vsel %vm495_vm0, %v1599_v8, %v4695_v59  ;;  %v1782_v25 = vrot.slane %v4657_v9, 1 }
 0x152   : > { %1320 = vrot.lane.b32.xlu0 %v1273_v52, %s3507_s12 }
 0x153   : > { %v4668_v3 = vpop.permute.xlu1 %1336  ;;  %v1700_v55 = vsel %vm495_vm0, %v1695_v31, %v4690_v37  ;;  %v1807_v31 = vsel %vm740_vm1, %v1804_v63, %v1806_v4  ;;  %v3416_v63 = vld [vmem:[%s3598_s7 + $0x88] sm:$0xff]  }
 0x154   : > { %v4675_v50 = vpop.permute.xlu0 %1312 }
 0x155   : > { %1510 = vrot.lane.b32.xlu1 %v4419_v6, %s3508_s21  ;;  %v786_v6 = vrot.slane %v4728_v17, 1 }
 0x156   : > { %1486 = vrot.lane.b32.xlu0 %v4427_v21, %s3508_s21 }
 0x157   : > { %v1503_v29 = vpop.permute.xlu1 %1502 }
 0x158   : > { %v1479_v58 = vpop.permute.xlu0 %1478 }
 0x159   : > { %1512 = vrot.lane.b32.xlu1 %v4648_v20, %s3508_s21  ;;  %v1784_v20 = vrot.slane %v4673_v22, 1 }
 0x15a   : > { %1488 = vrot.lane.b32.xlu0 %v4657_v9, %s3508_s21  ;;  %v1874_v9 = vsel %vm1862_vm3, %v4040_v28, %v3932_v10  ;;  %v1783_v28 = vsel %vm740_vm1, %v1780_v61, %v1782_v25 }
 0x15b   : > { %v1505_v52 = vpop.permute.xlu1 %1504 }
 0x15c   : > { %v4697_v35 = vpop.permute.xlu0 %1480 }
 0x15d   : > { %1757 = vrot.lane.b32.xlu1 %v1692_v49, %s3509_s30  ;;  %v1945_v49 = vsel %vm1911_vm4, %v1896_v30, %v4573_v26  ;;  %v1898_v26 = vsel %vm1862_vm3, %v3416_v63, %v4008_v15  ;;  %v1809_v15 = vsel %vm740_vm1, %v1806_v4, %v1808_v62 }
 0x15e   : > { %1733 = vrot.lane.b32.xlu0 %v1596_v39, %s3509_s30  ;;  %v3414_v39 = vld [vmem:[%s3598_s7 + $0x20] sm:$0xff]   ;;  %v1994_v8 = vsel %vm1960_vm5, %v1945_v49, %v4601_v53  ;;  %v1947_v21 = vsel %vm1911_vm4, %v1898_v26, %v4587_v60 }
 0x15f   : > { %v1750_v0 = vpop.permute.xlu1 %1749  ;;  %v1872_v43 = vsel %vm1862_vm3, %v3414_v39, %v3936_v19  ;;  %v2043_v19 = vsel %vm2009_vm6, %v1994_v8, %v4623_v36  ;;  %v4758_v36 = vld [vmem:[%s3598_s7 + $0x58] sm:$0xff]   ;;  %v1996_v49 = vsel %vm1960_vm5, %v1947_v21, %v4612_v57  ;;  %v1093_v21 = vshrl.u32 %v4591_v14, 16 }
 0x160   : > { %v1726_v54 = vpop.permute.xlu0 %1725  ;;  %v1921_v10 = vsel %vm1911_vm4, %v1872_v43, %v4579_v7  ;;  %v1785_v7 = vsel %vm740_vm1, %v1782_v25, %v1784_v20 }
 0x161   : > { %1759 = vrot.lane.b32.xlu1 %v1700_v55, %s3509_s30  ;;  %v1970_v53 = vsel %vm1960_vm5, %v1921_v10, %v4605_v24 }
 0x162   : > { %1735 = vrot.lane.b32.xlu0 %v1604_v34, %s3509_s30  ;;  %v2092_v34 = vsel %vm2058_vm7, %v2043_v19, %v4651_v5  ;;  %v2019_v61 = vsel %vm2009_vm6, %v1970_v53, %v4627_v48  ;;  %v762_v5 = vrot.slane %v4758_v36, 1  ;;  %v787_v48 = vsel %vm740_vm1, %v784_v41, %v786_v6  ;;  %v3389_v19 = vld [vmem:[%s3598_s7 + $0xc4] sm:$0xff]  }
 0x163   : > { %v1752_v55 = vpop.permute.xlu1 %1751  ;;  %v2141_v24 = vsel %vm2107_vm8, %v2092_v34, %v1503_v29  ;;  %v2068_v4 = vsel %vm2058_vm7, %v2019_v61, %v4659_v33  ;;  %v1923_v29 = vsel %vm1911_vm4, %v1874_v9, %v4593_v42  ;;  %v3390_v53 = vld [vmem:[%s3598_s7 + $0x64] sm:$0xff]  }
 0x164   : > { %v1728_v30 = vpop.permute.xlu0 %1727  ;;  %v2190_v25 = vsel %vm2156_vm9, %v2141_v24, %v1750_v0  ;;  %v2117_v57 = vsel %vm2107_vm8, %v2068_v4, %v1479_v58  ;;  %v1972_v0 = vsel %vm1960_vm5, %v1923_v29, %v4617_v47  ;;  %v3418_v58 = vld [vmem:[%s3598_s7 + $0xc0] ss:$0 sps:$4 sm:$0xff]   ;;  %v763_v63 = vsel %vm740_vm1, %v760_v46, %v762_v5 }
 0x165   : > { %1854 = vrot.lane.b32.xlu1 %v1807_v31, %s3510_s5  ;;  %v2045_v31 = vsel %vm2009_vm6, %v1996_v49, %v4635_v45  ;;  %v2166_v43 = vsel %vm2156_vm9, %v2117_v57, %v1726_v54  ;;  %v2021_v41 = vsel %vm2009_vm6, %v1972_v0, %v4641_v13  ;;  %v788_v47 = vrot.slane %v3418_v58, 1 }
 0x166   : > { %1830 = vrot.lane.b32.xlu0 %v1783_v28, %s3510_s5  ;;  %v2094_v39 = vsel %vm2058_vm7, %v2045_v31, %v4668_v3  ;;  %v2070_v3 = vsel %vm2058_vm7, %v2021_v41, %v4675_v50  ;;  %v5346_v46 = vrot.slane %v3642_v56, 1  ;;  %v1097_v61 = vshll.u32 %v3390_v53, 16 }
 0x167   : > { %v1847_v60 = vpop.permute.xlu1 %1846  ;;  %v2143_v42 = vsel %vm2107_vm8, %v2094_v39, %v1505_v52  ;;  %v2119_v13 = vsel %vm2107_vm8, %v2070_v3, %v4697_v35  ;;  %v789_v10 = vsel %vm740_vm1, %v786_v6, %v788_v47  ;;  %v3391_v6 = vld [vmem:[%s3598_s7 + $0xcc] ss:$0 sps:$4 sm:$0xff]   ;;  %v1197_v49 = vshrl.u32 %v3389_v19, 16 }
 0x168   : > { %v2239_v33 = vsel %vm2205_vm10, %v2190_v25, %v1847_v60  ;;  %v1823_v8 = vpop.permute.xlu0 %1822  ;;  %v2192_v54 = vsel %vm2156_vm9, %v2143_v42, %v1752_v55  ;;  %v2168_v26 = vsel %vm2156_vm9, %v2119_v13, %v1728_v30  ;;  %v765_v28 = vsel %vm740_vm1, %v762_v5, %v5346_v46 }
 0x169   : > { %1856 = vrot.lane.b32.xlu1 %v1809_v15, %s3510_s5  ;;  %3227 = vmatprep.mubr.msk.bf16.mxu1 %vm2274_vm11, %v2239_v33  ;;  %v2215_v45 = vsel %vm2205_vm10, %v2166_v43, %v1823_v8  ;;  %v1189_v30 = vshrl.u32 %v4584_v38, 16  ;;  %v1193_v15 = vshll.u32 %v3389_v19, 16  ;;  %v1201_v4 = vshll.u32 %v3391_v6, 16 }
 0x16a   : > { %1832 = vrot.lane.b32.xlu0 %v1785_v7, %s3510_s5  ;;  %3203 = vmatprep.mubr.msk.bf16.mxu0 %vm2274_vm11, %v2215_v45  ;;  %v1095_v60 = vor.u32 %v1093_v21, %v4615_v16  ;;  %v1101_v29 = vshrl.u32 %v3390_v53, 16  ;;  %v1298_v41 = vrot.slane %v3389_v19, 1  ;;  %v1274_v58 = vrot.slane %v3390_v53, 1 }
 0x16b   : > { %v1849_v9 = vpop.permute.xlu1 %1848  ;;  %v1191_v56 = vor.u32 %v1189_v30, %v4609_v23  ;;  %v1195_v5 = vrot.slane %v1193_v15, 1  ;;  %v1203_v23 = vrot.slane %v1201_v4, 1  ;;  %v1605_v46 = vshrl.u32 %v4673_v22, 16 }
 0x16c   : > { %v2241_v52 = vsel %vm2205_vm10, %v2192_v54, %v1849_v9  ;;  %v1825_v50 = vpop.permute.xlu0 %1824  ;;  %v1299_v3 = vsel %vm740_vm1, %v1296_v27, %v1298_v41  ;;  %v1300_v54 = vrot.slane %v3391_v6, 1  ;;  %v5347_v27 = vrot.slane %v3735_v1, 1 }
 0x16d   : > { %834 = vrot.lane.b32.xlu1 %v787_v48, %s3504_s9  ;;  %3228 = vmatmul.mubr.msk.bf16.gmra.mrb[8].mxu1 %vm2274_vm11, %v2241_v52  ;;  %v2217_v55 = vsel %vm2205_vm10, %v2168_v26, %v1825_v50  ;;  %v1099_v48 = vrot.slane %v1097_v61, 1  ;;  %v1196_v57 = vsel %vm495_vm0, %v1191_v56, %v1195_v5  ;;  %v1199_v33 = vor.u32 %v1197_v49, %v1195_v5  ;;  %v4873_v50 = vld [vmem:[%s3598_s7 + $0x70] sm:$0xff]  }
 0x16e   : > { %810 = vrot.lane.b32.xlu0 %v763_v63, %s3504_s9  ;;  %3204 = vmatmul.mubr.msk.bf16.gmra.mrb[8].mxu0 %vm2274_vm11, %v2217_v55  ;;  %v1301_v52 = vsel %vm740_vm1, %v1298_v41, %v1300_v54  ;;  %v4866_v63 = vld [vmem:[%s3598_s7 + $0xd0] sm:$0xff]   ;;  %v1277_v26 = vsel %vm740_vm1, %v1274_v58, %v5347_v27  ;;  %v1609_v1 = vshll.u32 %v4873_v50, 16  ;;  %v1607_v61 = vor.u32 %v1605_v46, %v4695_v59 }
 0x16f   : > { %v4807_v35 = vpop.permute.xlu1 %826  ;;  %v1100_v39 = vsel %vm495_vm0, %v1095_v60, %v1099_v48  ;;  %v1103_v43 = vor.u32 %v1101_v29, %v1099_v48  ;;  %v1204_v16 = vsel %vm495_vm0, %v1199_v33, %v1203_v23  ;;  %v1705_v55 = vshll.u32 %v4866_v63, 16  ;;  %v3420_v27 = vld [vmem:[%s3598_s7 + $0x30] sm:$0xff]  }
 0x170   : > { %v4813_v34 = vpop.permute.xlu0 %802  ;;  %v1709_v15 = vshrl.u32 %v4866_v63, 16  ;;  %v1611_v56 = vrot.slane %v1609_v1, 1  ;;  %v1613_v5 = vshrl.u32 %v4873_v50, 16  ;;  %v1810_v23 = vrot.slane %v4866_v63, 1  ;;  %v5352_v1 = vld [vmem:[#allocation13_spill] sm:$0xff] }
 0x171   : > { %836 = vrot.lane.b32.xlu1 %v789_v10, %s3504_s9  ;;  %v1108_v45 = vsel %vm495_vm0, %v1103_v43, %v3753_v51  ;;  %v1275_v51 = vsel %vm740_vm1, %v1272_v12, %v1274_v58  ;;  %v1701_v12 = vshrl.u32 %v4665_v18, 16  ;;  %v3394_v10 = vld [vmem:[%s3598_s7 + $0xd8] ss:$0 sps:$4 sm:$0xff]   ;;  %v1707_v30 = vrot.slane %v1705_v55, 1  ;;  %v5348_v43 = vld [vmem:[#allocation6_spill] sm:$0xff] }
 0x172   : > { %812 = vrot.lane.b32.xlu0 %v765_v28, %s3504_s9  ;;  %v1713_v6 = vshll.u32 %v3394_v10, 16  ;;  %v1612_v29 = vsel %vm495_vm0, %v1607_v61, %v1611_v56  ;;  %v1786_v41 = vrot.slane %v4873_v50, 1  ;;  %v5349_v58 = vld [vmem:[#allocation14_spill] sm:$0xff] }
 0x173   : > { %v4819_v7 = vpop.permute.xlu1 %828  ;;  %v1711_v4 = vor.u32 %v1709_v15, %v1707_v30 }
 0x174   : > { %v4822_v24 = vpop.permute.xlu0 %804  ;;  %v1715_v60 = vrot.slane %v1713_v6, 1 }
 0x175   : > { %1002 = vrot.lane.b32.xlu1 %v4584_v38, %s3505_s10 }
 0x176   : > { %978 = vrot.lane.b32.xlu0 %v4591_v14, %s3505_s10  ;;  %v1716_v33 = vsel %vm495_vm0, %v1711_v4, %v1715_v60 }
 0x177   : > { %v4829_v25 = vpop.permute.xlu1 %994 }
 0x178   : > { %v4832_v31 = vpop.permute.xlu0 %970 }
 0x179   : > { %1004 = vrot.lane.b32.xlu1 %v3389_v19, %s3505_s10 }
 0x17a   : > { %980 = vrot.lane.b32.xlu0 %v3390_v53, %s3505_s10  ;;  %v1703_v53 = vor.u32 %v1701_v12, %v4690_v37 }
 0x17b   : > { %v4837_v0 = vpop.permute.xlu1 %996 }
 0x17c   : > { %v4840_v8 = vpop.permute.xlu0 %972  ;;  %v1708_v37 = vsel %vm495_vm0, %v1703_v53, %v1707_v30  ;;  %v5353_v53 = vld [vmem:[#allocation19_spill] sm:$0xff] }
 0x17d   : > { %1249 = vrot.lane.b32.xlu1 %v1196_v57, %s3506_s11  ;;  %v1615_v57 = vor.u32 %v1613_v5, %v1611_v56  ;;  %v5354_v56 = vld [vmem:[#allocation5_spill] sm:$0xff] }
 0x17e   : > { %1225 = vrot.lane.b32.xlu0 %v1100_v39, %s3506_s11 }
 0x17f   : > { %v4845_v42 = vpop.permute.xlu1 %1241 }
 0x180   : > { %v4849_v47 = vpop.permute.xlu0 %1217 }
 0x181   : > { %1251 = vrot.lane.b32.xlu1 %v1204_v16, %s3506_s11  ;;  %v1620_v16 = vsel %vm495_vm0, %v1615_v57, %v5348_v43 }
 0x182   : > { %1227 = vrot.lane.b32.xlu0 %v1108_v45, %s3506_s11  ;;  %v3419_v45 = vld [vmem:[%s3598_s7 + $0x90] sm:$0xff]  }
 0x183   : > { %v4856_v9 = vpop.permute.xlu1 %1243 }
 0x184   : > { %v4861_v13 = vpop.permute.xlu0 %1219 }
 0x185   : > { %1346 = vrot.lane.b32.xlu1 %v1299_v3, %s3507_s12  ;;  %v1900_v3 = vsel %vm1862_vm3, %v3419_v45, %v5349_v58 }
 0x186   : > { %1322 = vrot.lane.b32.xlu0 %v1275_v51, %s3507_s12  ;;  %v1949_v51 = vsel %vm1911_vm4, %v1900_v3, %v4807_v35 }
 0x187   : > { %v1339_v38 = vpop.permute.xlu1 %1338 }
 0x188   : > { %v4875_v14 = vpop.permute.xlu0 %1314 }
 0x189   : > { %1348 = vrot.lane.b32.xlu1 %v1301_v52, %s3507_s12  ;;  %v1811_v52 = vsel %vm740_vm1, %v1808_v62, %v1810_v23  ;;  %v5351_v62 = vld [vmem:[#allocation7_spill] sm:$0xff] }
 0x18a   : > { %1324 = vrot.lane.b32.xlu0 %v1277_v26, %s3507_s12  ;;  %v5350_v26 = vld [vmem:[#allocation8_spill] sm:$0xff]  ;;  %s5028_s12 = smul.u32 384, %s202_s6 }
 0x18b   : > { %v4882_v19 = vpop.permute.xlu1 %1340  ;;  %v1876_v12 = vsel %vm1862_vm3, %v3420_v27, %v5350_v26 }
 0x18c   : > { %v4886_v28 = vpop.permute.xlu0 %1316  ;;  %v1925_v46 = vsel %vm1911_vm4, %v1876_v12, %v4813_v34  ;;  %s5050_s13 = scalar_lea.vmem [#allocation2], %s5028_s12 }
 0x18d   : > { %1514 = vrot.lane.b32.xlu1 %v4665_v18, %s3508_s21  ;;  %v1787_v18 = vsel %vm740_vm1, %v1784_v20, %v1786_v41  ;;  %v1974_v30 = vsel %vm1960_vm5, %v1925_v46, %v4832_v31 }
 0x18e   : > { %1490 = vrot.lane.b32.xlu0 %v4673_v22, %s3508_s21  ;;  %v2023_v20 = vsel %vm2009_vm6, %v1974_v30, %v4849_v47 }
 0x18f   : > { %v1507_v21 = vpop.permute.xlu1 %1506  ;;  %v2072_v31 = vsel %vm2058_vm7, %v2023_v20, %v4875_v14  ;;  %v5359_v20 = vld [vmem:[#allocation16_spill] sm:$0xff] }
 0x190   : > { %v1483_v49 = vpop.permute.xlu0 %1482 }
 0x191   : > { %1516 = vrot.lane.b32.xlu1 %v4866_v63, %s3508_s21  ;;  %v1812_v63 = vrot.slane %v3394_v10, 1  ;;  %v1878_v10 = vsel %vm1862_vm3, %v4225_v40, %v5351_v62 }
 0x192   : > { %1492 = vrot.lane.b32.xlu0 %v4873_v50, %s3508_s21  ;;  %v1998_v50 = vsel %vm1960_vm5, %v1949_v51, %v4829_v25  ;;  %v1902_v25 = vsel %vm1862_vm3, %v5353_v53, %v5352_v1  ;;  %v1927_v47 = vsel %vm1911_vm4, %v1878_v10, %v4822_v24  ;;  %v5356_v10 = vld [vmem:[#allocation9_spill] sm:$0xff]  ;;  %v3421_v53 = vld [vmem:[%s3598_s7 + $0x40] sm:$0xff]   ;;  %s2869_s21 = sshll.u32 %s5050_s13, 4  ;;  %s5239_s21 = int_to_ptr.vmem [resolvable:$true] %s2869_s21 }
 0x193   : > { %v1509_v48 = vpop.permute.xlu1 %1508  ;;  %v2047_v35 = vsel %vm2009_vm6, %v1998_v50, %v4845_v42  ;;  %v1951_v22 = vsel %vm1911_vm4, %v1902_v25, %v4819_v7  ;;  %v1813_v42 = vsel %vm740_vm1, %v1810_v23, %v1812_v63  ;;  %v5355_v7 = vrot.slane %v5354_v56, 1  ;;  %v5357_v25 = vld [vmem:[#allocation10_spill] sm:$0xff]  ;;  %s3423_s29 = scalar_lea.vmem %s5239_s21, 6144 }
 0x194   : > { %v1485_v59 = vpop.permute.xlu0 %1484  ;;  %v2096_v34 = vsel %vm2058_vm7, %v2047_v35, %v1339_v38  ;;  %v2000_v6 = vsel %vm1960_vm5, %v1951_v22, %v4837_v0  ;;  %v2121_v0 = vsel %vm2107_vm8, %v2072_v31, %v1483_v49  ;;  %v1976_v14 = vsel %vm1960_vm5, %v1927_v47, %v4840_v8  ;;  %v3422_v22 = vld [vmem:[%s3598_s7 + $0xa0] sm:$0xff]   ;;  %p3424_p12 = scmp.ne.s32.totalorder %s5239_s21, %s3423_s29 }
 0x195   : > { %1761 = vrot.lane.b32.xlu1 %v1708_v37, %s3509_s30  ;;  %v2145_v40 = vsel %vm2107_vm8, %v2096_v34, %v1507_v21  ;;  %v1789_v5 = vsel %vm740_vm1, %v1786_v41, %v5355_v7  ;;  %v2049_v21 = vsel %vm2009_vm6, %v2000_v6, %v4856_v9  ;;  %v2025_v24 = vsel %vm2009_vm6, %v1976_v14, %v4861_v13  ;;  %v5358_v34 = vld [vmem:[#allocation15_spill] sm:$0xff] }
 0x196   : > { %1737 = vrot.lane.b32.xlu0 %v1612_v29, %s3509_s30  ;;  %v2098_v4 = vsel %vm2058_vm7, %v2049_v21, %v4882_v19  ;;  %v2074_v8 = vsel %vm2058_vm7, %v2025_v24, %v4886_v28  ;;  %v1882_v1 = vsel %vm1862_vm3, %v4514_v44, %v5356_v10  ;;  %v1880_v30 = vsel %vm1862_vm3, %v3421_v53, %v5357_v25  ;;  %p3425_p13 = pnand %p3424_p12, %p3578_p4 }
 0x197   : > { %v1754_v39 = vpop.permute.xlu1 %1753  ;;  %v2147_v9 = vsel %vm2107_vm8, %v2098_v4, %v1509_v48 }
 0x198   : > { %v1730_v54 = vpop.permute.xlu0 %1729  ;;  %v2194_v38 = vsel %vm2156_vm9, %v2145_v40, %v1754_v39  ;;  %v1904_v40 = vsel %vm1862_vm3, %v3422_v22, %v5359_v20  ;;  %p3426_p0 = pneg %p3425_p13 }
 0x199   : > { %1763 = vrot.lane.b32.xlu1 %v1716_v33, %s3509_s30  ;;  %v2170_v60 = vsel %vm2156_vm9, %v2121_v0, %v1730_v54  ;;  %v2123_v33 = vsel %vm2107_vm8, %v2074_v8, %v1485_v59 }
 0x19a   : > { %1739 = vrot.lane.b32.xlu0 %v1620_v16, %s3509_s30  ;;  %s3511_s30 = smov [#allocation2]  }
 0x19b   : > { %v1756_v55 = vpop.permute.xlu1 %1755 }
 0x19c   : > { %v1732_v15 = vpop.permute.xlu0 %1731  ;;  %v2196_v57 = vsel %vm2156_vm9, %v2147_v9, %v1756_v55  ;;  %v5021_v9 = vld [vmem:[%s5295_s3] ss:$0 sm:$0xff] }
 0x19d   : > { %1858 = vrot.lane.b32.xlu1 %v1811_v52, %s3510_s5  ;;  %v2172_v13 = vsel %vm2156_vm9, %v2123_v33, %v1732_v15  ;;  %v1906_v15 = vsel %vm1862_vm3, %v4484_v32, %v5358_v34 }
 0x19e   : > { %1834 = vrot.lane.b32.xlu0 %v1787_v18, %s3510_s5 }
 0x19f   : > { %v1851_v61 = vpop.permute.xlu1 %1850 }
 0x1a0   : > { %v2243_v37 = vsel %vm2205_vm10, %v2194_v38, %v1851_v61  ;;  %v1827_v29 = vpop.permute.xlu0 %1826 }
 0x1a1   : > { %1860 = vrot.lane.b32.xlu1 %v1813_v42, %s3510_s5  ;;  %3231 = vmatprep.mubr.msk.bf16.mxu1 %vm2274_vm11, %v2243_v37  ;;  %v2219_v49 = vsel %vm2205_vm10, %v2170_v60, %v1827_v29 }
 0x1a2   : > { %1836 = vrot.lane.b32.xlu0 %v1789_v5, %s3510_s5  ;;  %3207 = vmatprep.mubr.msk.bf16.mxu0 %vm2274_vm11, %v2219_v49  ;;  %v5008_v5 = vld [vmem:[%s5294_s2] ss:$0 sm:$0xff]  ;;  %s3427_s5 = sshll.u32 %s3511_s30, 4  ;;  %s3428_s5 = int_to_ptr.vmem [resolvable:$false] %s3427_s5 }
 0x1a3   : > { %v1853_v19 = vpop.permute.xlu1 %1852  ;;  %s3429_s7 = scalar_lea.vmem %s3428_s5, 12288  ;;  %p3430_p1 = scmp.lt.s32.totalorder %s5239_s21, %s3428_s5 }
 0x1a4   : > { %v2245_v23 = vsel %vm2205_vm10, %v2196_v57, %v1853_v19  ;;  %v1829_v39 = vpop.permute.xlu0 %1828  ;;  %p3431_p2 = scmp.lt.s32.totalorder %s3429_s7, %s3423_s29 }
 0x1a5   : > { %3232 = vmatmul.mubr.msk.bf16.gmra.mrb[12].mxu1 %vm2274_vm11, %v2245_v23  ;;  %v2221_v48 = vsel %vm2205_vm10, %v2172_v13, %v1829_v39 }
 0x1a6   : > { %3208 = vmatmul.mubr.msk.bf16.gmra.mrb[12].mxu0 %vm2274_vm11, %v2221_v48  ;;  %p3432_p3 = por %p3431_p2, %p3430_p1 }
 0x1a7   : > { %v831_v28 = vpop.permute.xlu1 %830 }
 0x1a8   : > { %v807_v43 = vpop.permute.xlu0 %806  ;;  %v1953_v42 = vsel %vm1911_vm4, %v1904_v40, %v831_v28  ;;  %p3433_p5 = pnand %p3432_p3, %p3426_p0 }
 0x1a9   : > { %v1929_v6 = vsel %vm1911_vm4, %v1880_v30, %v807_v43 }
 0x1ab   : > { %v833_v16 = vpop.permute.xlu1 %832 }
 0x1ac   : > { %v809_v41 = vpop.permute.xlu0 %808  ;;  %v1955_v31 = vsel %vm1911_vm4, %v1906_v15, %v833_v16 }
 0x1ad   : > { %v1931_v44 = vsel %vm1911_vm4, %v1882_v1, %v809_v41 }
 0x1af   : > { %v999_v45 = vpop.permute.xlu1 %998 }
 0x1b0   : > { %v975_v58 = vpop.permute.xlu0 %974  ;;  %v2002_v61 = vsel %vm1960_vm5, %v1953_v42, %v999_v45 }
 0x1b1   : > { %v1978_v56 = vsel %vm1960_vm5, %v1929_v6, %v975_v58 }
 0x1b3   : > { %v1001_v3 = vpop.permute.xlu1 %1000 }
 0x1b4   : > { %v977_v59 = vpop.permute.xlu0 %976  ;;  %v2004_v7 = vsel %vm1960_vm5, %v1955_v31, %v1001_v3 }
 0x1b5   : > { %v1980_v32 = vsel %vm1960_vm5, %v1931_v44, %v977_v59 }
 0x1b7   : > { %v1246_v54 = vpop.permute.xlu1 %1245 }
 0x1b8   : > { %v1222_v51 = vpop.permute.xlu0 %1221  ;;  %v2051_v47 = vsel %vm2009_vm6, %v2002_v61, %v1246_v54 }
 0x1b9   : > { %v2027_v21 = vsel %vm2009_vm6, %v1978_v56, %v1222_v51 }
 0x1bb   : > { %v1248_v52 = vpop.permute.xlu1 %1247 }
 0x1bc   : > { %v1224_v63 = vpop.permute.xlu0 %1223  ;;  %v2053_v0 = vsel %vm2009_vm6, %v2004_v7, %v1248_v52 }
 0x1bd   : > { %v2029_v37 = vsel %vm2009_vm6, %v1980_v32, %v1224_v63 }
 0x1bf   : > { %v1343_v27 = vpop.permute.xlu1 %1342 }
 0x1c0   : > { %v1319_v26 = vpop.permute.xlu0 %1318  ;;  %v2100_v4 = vsel %vm2058_vm7, %v2051_v47, %v1343_v27 }
 0x1c1   : > { %v2076_v60 = vsel %vm2058_vm7, %v2027_v21, %v1319_v26 }
 0x1c3   : > { %v1345_v12 = vpop.permute.xlu1 %1344 }
 0x1c4   : > { %v1321_v50 = vpop.permute.xlu0 %1320  ;;  %v2102_v29 = vsel %vm2058_vm7, %v2053_v0, %v1345_v12 }
 0x1c5   : > { %v2078_v24 = vsel %vm2058_vm7, %v2029_v37, %v1321_v50 }
 0x1c7   : > { %v1511_v55 = vpop.permute.xlu1 %1510 }
 0x1c8   : > { %v1487_v46 = vpop.permute.xlu0 %1486  ;;  %v2149_v8 = vsel %vm2107_vm8, %v2100_v4, %v1511_v55 }
 0x1c9   : > { %v2125_v57 = vsel %vm2107_vm8, %v2076_v60, %v1487_v46 }
 0x1cb   : > { %v1513_v35 = vpop.permute.xlu1 %1512 }
 0x1cc   : > { %v1489_v18 = vpop.permute.xlu0 %1488  ;;  %v2151_v19 = vsel %vm2107_vm8, %v2102_v29, %v1513_v35 }
 0x1cd   : > { %v2127_v39 = vsel %vm2107_vm8, %v2078_v24, %v1489_v18 }
 0x1cf   : > { %v1758_v62 = vpop.permute.xlu1 %1757 }
 0x1d0   : > { %v1734_v38 = vpop.permute.xlu0 %1733  ;;  %v2198_v48 = vsel %vm2156_vm9, %v2149_v8, %v1758_v62 }
 0x1d1   : > { %v2174_v28 = vsel %vm2156_vm9, %v2125_v57, %v1734_v38 }
 0x1d3   : > { %v1760_v14 = vpop.permute.xlu1 %1759 }
 0x1d4   : > { %v3221_v49 = vpop.f32.mrb[0].mxu1  ;;  %v1736_v33 = vpop.permute.xlu0 %1735  ;;  %v2200_v45 = vsel %vm2156_vm9, %v2151_v19, %v1760_v14 }
 0x1d5   : > { %v2585_v23 = vmul.f32 %v3221_v49, %v5008_v5  ;;  %v2457_v13 = vpop.f32.mrb[1].mxu1  ;;  %v3197_v43 = vpop.f32.mrb[0].mxu0  ;;  %v2176_v52 = vsel %vm2156_vm9, %v2127_v39, %v1736_v33 }
 0x1d6   : > { %v2583_v16 = vmul.f32 %v5008_v5, %v2457_v13  ;;  %v3222_v41 = vpop.f32.mrb[2].mxu1  ;;  %v2561_v58 = vmul.f32 %v3197_v43, %v5008_v5  ;;  %v2361_v59 = vpop.f32.mrb[1].mxu0 }
 0x1d7   : > { %v2640_v3 = vadd.f32 %v5021_v9, %v2585_v23  ;;  %v2586_v54 = vmul.f32 %v3222_v41, %v5008_v5  ;;  %v1855_v51 = vpop.permute.xlu1 %1854  ;;  %v2559_v63 = vmul.f32 %v5008_v5, %v2361_v59  ;;  %v3198_v26 = vpop.f32.mrb[2].mxu0 }
 0x1d8   : > { %v2638_v27 = vadd.f32 %v5021_v9, %v2583_v16  ;;  %v2247_v12 = vsel %vm2205_vm10, %v2198_v48, %v1855_v51  ;;  %v2460_v50 = vpop.f32.mrb[3].mxu1  ;;  %v2616_v55 = vadd.f32 %v5021_v9, %v2561_v58  ;;  %v2562_v35 = vmul.f32 %v3198_v26, %v5008_v5  ;;  %v2364_v18 = vpop.f32.mrb[3].mxu0  ;;  %v5360_v51 = vld [vmem:[#allocation18_spill] sm:$0xff]  ;;  %v5362_v26 = vld [vmem:[#allocation12_spill] sm:$0xff] }
 0x1d9   : > { %vm2688_vm12 = vcmp.ge.f32.partialorder %v2640_v3, 0.0  ;;  %v2736_v46 = vmul.f32 0.2, %v2640_v3  ;;  %v1831_v62 = vpop.permute.xlu0 %1830  ;;  %3235 = vmatprep.mubr.msk.bf16.mxu1 %vm2274_vm11, %v2247_v12  ;;  %v2614_v10 = vadd.f32 %v5021_v9, %v2559_v63  ;;  %v2641_v53 = vadd.f32 %v5021_v9, %v2586_v54  ;;  %v5361_v63 = vld [vmem:[#allocation11_spill] sm:$0xff] }
 0x1da   : > { %vm2686_vm13 = vcmp.ge.f32.partialorder %v2638_v27, 0.0  ;;  %v2734_v1 = vmul.f32 0.2, %v2638_v27  ;;  %vm2664_vm14 = vcmp.ge.f32.partialorder %v2616_v55, 0.0  ;;  %v2712_v25 = vmul.f32 0.2, %v2616_v55 }
 0x1db   : > { %v2784_v30 = vsel %vm2688_vm12, %v2640_v3, %v2736_v46  ;;  %v2617_v34 = vadd.f32 %v5021_v9, %v2562_v35  ;;  %v1857_v15 = vpop.permute.xlu1 %1856  ;;  %vm2662_vm15 = vcmp.ge.f32.partialorder %v2614_v10, 0.0  ;;  %v2710_v22 = vmul.f32 0.2, %v2614_v10 }
 0x1dc   : > { %2832 = vst [vmem:[%s5050_s13 + $0xd0] sm:$0xff] %v2784_v30  ;;  %v2782_v20 = vsel %vm2686_vm13, %v2638_v27, %v2734_v1  ;;  %vm2689_vm0 = vcmp.ge.f32.partialorder %v2641_v53, 0.0  ;;  %v2760_v40 = vsel %vm2664_vm14, %v2616_v55, %v2712_v25  ;;  %v2737_v6 = vmul.f32 0.2, %v2641_v53 }
 0x1dd   : > { %2830 = vst [vmem:[%s5050_s13 + $0xc0] sm:$0xff] %v2782_v20  ;;  %vm2665_vm1 = vcmp.ge.f32.partialorder %v2617_v34, 0.0  ;;  %v2713_v42 = vmul.f32 0.2, %v2617_v34  ;;  %v1833_v31 = vpop.permute.xlu0 %1832  ;;  %2808 = vst [vmem:[%s5050_s13 + $0x10] sm:$0xff] %v2760_v40  ;;  %v2758_v44 = vsel %vm2662_vm15, %v2614_v10, %v2710_v22  ;;  %v2560_v38 = vmul.f32 %v5008_v5, %v2364_v18 }
 0x1de   : > { %v2584_v61 = vmul.f32 %v5008_v5, %v2460_v50  ;;  %v2223_v56 = vsel %vm2205_vm10, %v2174_v28, %v1831_v62  ;;  %2806 = vst [vmem:[%s5050_s13] sm:$0xff] %v2758_v44  ;;  %v2785_v32 = vsel %vm2689_vm0, %v2641_v53, %v2737_v6  ;;  %v2249_v47 = vsel %vm2205_vm10, %v2200_v45, %v1857_v15  ;;  %v5363_v50 = vld [vmem:[#allocation17_spill] sm:$0xff] }
 0x1df   : > { %v2761_v7 = vsel %vm2665_vm1, %v2617_v34, %v2713_v42  ;;  %3211 = vmatprep.mubr.msk.bf16.mxu0 %vm2274_vm11, %v2223_v56  ;;  %v2225_v21 = vsel %vm2205_vm10, %v2176_v52, %v1833_v31  ;;  %v835_v0 = vpop.permute.xlu1 %834  ;;  %2833 = vst [vmem:[%s5050_s13 + $0xd8] sm:$0xff] %v2785_v32  ;;  %v2615_v37 = vadd.f32 %v5021_v9, %v2560_v38 }
 0x1e0   : > { %2809 = vst [vmem:[%s5050_s13 + $0x18] sm:$0xff] %v2761_v7  ;;  %v2639_v14 = vadd.f32 %v5021_v9, %v2584_v61  ;;  %3212 = vmatmul.mubr.msk.bf16.gmra.mrb[16].mxu0 %vm2274_vm11, %v2225_v21  ;;  %3236 = vmatmul.mubr.msk.bf16.gmra.mrb[16].mxu1 %vm2274_vm11, %v2249_v47  ;;  %v1908_v52 = vsel %vm1862_vm3, %v4545_v2, %v5360_v51 }
 0x1e1   : > { %v811_v4 = vpop.permute.xlu0 %810  ;;  %vm2663_vm2 = vcmp.ge.f32.partialorder %v2615_v37, 0.0  ;;  %v2711_v60 = vmul.f32 0.2, %v2615_v37  ;;  %v1886_v27 = vsel %vm1862_vm3, %v4758_v36, %v5361_v63  ;;  %v1884_v12 = vsel %vm1862_vm3, %v4560_v11, %v5362_v26 }
 0x1e2   : > { %vm2687_vm12 = vcmp.ge.f32.partialorder %v2639_v14, 0.0  ;;  %v2735_v29 = vmul.f32 0.2, %v2639_v14  ;;  %v1910_v55 = vsel %vm1862_vm3, %v4728_v17, %v5363_v50  ;;  %v1957_v46 = vsel %vm1911_vm4, %v1908_v52, %v835_v0 }
 0x1e3   : > { %v837_v24 = vpop.permute.xlu1 %836  ;;  %v2759_v49 = vsel %vm2663_vm2, %v2615_v37, %v2711_v60  ;;  %v1933_v18 = vsel %vm1911_vm4, %v1884_v12, %v811_v4 }
 0x1e4   : > { %v2783_v8 = vsel %vm2687_vm12, %v2639_v14, %v2735_v29  ;;  %2807 = vst [vmem:[%s5050_s13 + $0x8] sm:$0xff] %v2759_v49  ;;  %v1959_v62 = vsel %vm1911_vm4, %v1910_v55, %v837_v24 }
 0x1e5   : > { %2831 = vst [vmem:[%s5050_s13 + $0xc8] sm:$0xff] %v2783_v8  ;;  %v813_v57 = vpop.permute.xlu0 %812 }
 0x1e6   : > { %v1935_v2 = vsel %vm1911_vm4, %v1886_v27, %v813_v57 }
 0x1e7   : > { %v1003_v19 = vpop.permute.xlu1 %1002 }
 0x1e8   : > { %v2006_v10 = vsel %vm1960_vm5, %v1957_v46, %v1003_v19 }
 0x1e9   : > { %v979_v33 = vpop.permute.xlu0 %978 }
 0x1ea   : > { %v1982_v36 = vsel %vm1960_vm5, %v1933_v18, %v979_v33 }
 0x1eb   : > { %v1005_v23 = vpop.permute.xlu1 %1004 }
 0x1ec   : > { %v2008_v1 = vsel %vm1960_vm5, %v1959_v62, %v1005_v23 }
 0x1ed   : > { %v981_v13 = vpop.permute.xlu0 %980 }
 0x1ee   : > { %v1984_v11 = vsel %vm1960_vm5, %v1935_v2, %v981_v13 }
 0x1ef   : > { %v1250_v39 = vpop.permute.xlu1 %1249 }
 0x1f0   : > { %v2055_v53 = vsel %vm2009_vm6, %v2006_v10, %v1250_v39 }
 0x1f1   : > { %v1226_v48 = vpop.permute.xlu0 %1225 }
 0x1f2   : > { %v2031_v25 = vsel %vm2009_vm6, %v1982_v36, %v1226_v48 }
 0x1f3   : > { %v1252_v28 = vpop.permute.xlu1 %1251 }
 0x1f4   : > { %v2057_v30 = vsel %vm2009_vm6, %v2008_v1, %v1252_v28 }
 0x1f5   : > { %v1228_v43 = vpop.permute.xlu0 %1227 }
 0x1f6   : > { %v2033_v34 = vsel %vm2009_vm6, %v1984_v11, %v1228_v43 }
 0x1f7   : > { %v1347_v16 = vpop.permute.xlu1 %1346 }
 0x1f8   : > { %v2104_v15 = vsel %vm2058_vm7, %v2055_v53, %v1347_v16 }
 0x1f9   : > { %v1323_v41 = vpop.permute.xlu0 %1322 }
 0x1fa   : > { %v2080_v20 = vsel %vm2058_vm7, %v2031_v25, %v1323_v41 }
 0x1fb   : > { %v1349_v45 = vpop.permute.xlu1 %1348 }
 0x1fc   : > { %v2106_v40 = vsel %vm2058_vm7, %v2057_v30, %v1349_v45 }
 0x1fd   : > { %v1325_v58 = vpop.permute.xlu0 %1324 }
 0x1fe   : > { %v2082_v42 = vsel %vm2058_vm7, %v2033_v34, %v1325_v58 }
 0x1ff   : > { %v1515_v3 = vpop.permute.xlu1 %1514 }
 0x200   : > { %v2153_v38 = vsel %vm2107_vm8, %v2104_v15, %v1515_v3 }
 0x201   : > { %v1491_v59 = vpop.permute.xlu0 %1490 }
 0x202   : > { %v2129_v61 = vsel %vm2107_vm8, %v2080_v20, %v1491_v59 }
 0x203   : > { %v1517_v54 = vpop.permute.xlu1 %1516 }
 0x204   : > { %v2155_v56 = vsel %vm2107_vm8, %v2106_v40, %v1517_v54 }
 0x205   : > { %v1493_v35 = vpop.permute.xlu0 %1492 }
 0x206   : > { %v2131_v21 = vsel %vm2107_vm8, %v2082_v42, %v1493_v35 }
 0x207   : > { %v1762_v17 = vpop.permute.xlu1 %1761 }
 0x208   : > { %v3225_v22 = vpop.f32.mrb[4].mxu1  ;;  %v2202_v29 = vsel %vm2156_vm9, %v2153_v38, %v1762_v17 }
 0x209   : > { %v1738_v6 = vpop.permute.xlu0 %1737  ;;  %v2589_v31 = vmul.f32 %v3225_v22, %v5008_v5  ;;  %v2473_v44 = vpop.f32.mrb[5].mxu1 }
 0x20a   : > { %v3201_v7 = vpop.f32.mrb[4].mxu0  ;;  %v2587_v32 = vmul.f32 %v5008_v5, %v2473_v44  ;;  %v3226_v47 = vpop.f32.mrb[6].mxu1  ;;  %v2178_v24 = vsel %vm2156_vm9, %v2129_v61, %v1738_v6 }
 0x20b   : > { %v2565_v0 = vmul.f32 %v3201_v7, %v5008_v5  ;;  %v2644_v37 = vadd.f32 %v5021_v9, %v2589_v31  ;;  %v2377_v14 = vpop.f32.mrb[5].mxu0  ;;  %v2590_v4 = vmul.f32 %v3226_v47, %v5008_v5  ;;  %v1764_v60 = vpop.permute.xlu1 %1763 }
 0x20c   : > { %v2563_v49 = vmul.f32 %v5008_v5, %v2377_v14  ;;  %v2642_v8 = vadd.f32 %v5021_v9, %v2587_v32  ;;  %v3202_v57 = vpop.f32.mrb[6].mxu0  ;;  %v2476_v19 = vpop.f32.mrb[7].mxu1  ;;  %v2204_v12 = vsel %vm2156_vm9, %v2155_v56, %v1764_v60 }
 0x20d   : > { %v2620_v33 = vadd.f32 %v5021_v9, %v2565_v0  ;;  %vm2692_vm3 = vcmp.ge.f32.partialorder %v2644_v37, 0.0  ;;  %v2740_v23 = vmul.f32 0.2, %v2644_v37  ;;  %v2566_v13 = vmul.f32 %v3202_v57, %v5008_v5  ;;  %v2380_v39 = vpop.f32.mrb[7].mxu0  ;;  %v1740_v48 = vpop.permute.xlu0 %1739 }
 0x20e   : > { %v2618_v28 = vadd.f32 %v5021_v9, %v2563_v49  ;;  %vm2690_vm4 = vcmp.ge.f32.partialorder %v2642_v8, 0.0  ;;  %v2738_v43 = vmul.f32 0.2, %v2642_v8  ;;  %v2645_v16 = vadd.f32 %v5021_v9, %v2590_v4 }
 0x20f   : > { %vm2668_vm5 = vcmp.ge.f32.partialorder %v2620_v33, 0.0  ;;  %v2716_v41 = vmul.f32 0.2, %v2620_v33  ;;  %v2788_v45 = vsel %vm2692_vm3, %v2644_v37, %v2740_v23  ;;  %v2621_v58 = vadd.f32 %v5021_v9, %v2566_v13  ;;  %v1859_v3 = vpop.permute.xlu1 %1858 }
 0x210   : > { %2836 = vst [vmem:[%s5050_s13 + $0xf0] sm:$0xff] %v2788_v45  ;;  %vm2666_vm6 = vcmp.ge.f32.partialorder %v2618_v28, 0.0  ;;  %v2714_v59 = vmul.f32 0.2, %v2618_v28  ;;  %v2786_v54 = vsel %vm2690_vm4, %v2642_v8, %v2738_v43  ;;  %vm2693_vm7 = vcmp.ge.f32.partialorder %v2645_v16, 0.0 }
 0x211   : > { %v2764_v51 = vsel %vm2668_vm5, %v2620_v33, %v2716_v41  ;;  %2834 = vst [vmem:[%s5050_s13 + $0xe0] sm:$0xff] %v2786_v54  ;;  %vm2669_vm8 = vcmp.ge.f32.partialorder %v2621_v58, 0.0  ;;  %v2717_v52 = vmul.f32 0.2, %v2621_v58  ;;  %v2741_v63 = vmul.f32 0.2, %v2645_v16  ;;  %v1835_v27 = vpop.permute.xlu0 %1834 }
 0x212   : > { %2812 = vst [vmem:[%s5050_s13 + $0x30] sm:$0xff] %v2764_v51  ;;  %v2762_v26 = vsel %vm2666_vm6, %v2618_v28, %v2714_v59  ;;  %v2564_v50 = vmul.f32 %v5008_v5, %v2380_v39  ;;  %v2588_v55 = vmul.f32 %v5008_v5, %v2476_v19  ;;  %v2251_v18 = vsel %vm2205_vm10, %v2202_v29, %v1859_v3 }
 0x213   : > { %2810 = vst [vmem:[%s5050_s13 + $0x20] sm:$0xff] %v2762_v26  ;;  %v2765_v46 = vsel %vm2669_vm8, %v2621_v58, %v2717_v52  ;;  %v2789_v35 = vsel %vm2693_vm7, %v2645_v16, %v2741_v63  ;;  %v2227_v62 = vsel %vm2205_vm10, %v2178_v24, %v1835_v27  ;;  %v1861_v2 = vpop.permute.xlu1 %1860  ;;  %3239 = vmatprep.mubr.msk.bf16.mxu1 %vm2274_vm11, %v2251_v18 }
 0x214   : > { %2813 = vst [vmem:[%s5050_s13 + $0x38] sm:$0xff] %v2765_v46  ;;  %2837 = vst [vmem:[%s5050_s13 + $0xf8] sm:$0xff] %v2789_v35  ;;  %v2619_v10 = vadd.f32 %v5021_v9, %v2564_v50  ;;  %v2643_v36 = vadd.f32 %v5021_v9, %v2588_v55  ;;  %3215 = vmatprep.mubr.msk.bf16.mxu0 %vm2274_vm11, %v2227_v62  ;;  %v2253_v1 = vsel %vm2205_vm10, %v2204_v12, %v1861_v2 }
 0x215   : > { %v2180_v11 = vsel %vm2156_vm9, %v2131_v21, %v1740_v48  ;;  %v1837_v53 = vpop.permute.xlu0 %1836  ;;  %3240 = vmatmul.mubr.msk.bf16.gmra.mrb[20].mxu1 %vm2274_vm11, %v2253_v1 }
 0x216   : > { %vm2667_vm13 = vcmp.ge.f32.partialorder %v2619_v10, 0.0  ;;  %v2715_v17 = vmul.f32 0.2, %v2619_v10  ;;  %vm2691_vm14 = vcmp.ge.f32.partialorder %v2643_v36, 0.0  ;;  %v2739_v25 = vmul.f32 0.2, %v2643_v36 }
 0x217   : > { %v2229_v30 = vsel %vm2205_vm10, %v2180_v11, %v1837_v53 }
 0x218   : > { %v2763_v34 = vsel %vm2667_vm13, %v2619_v10, %v2715_v17  ;;  %v2787_v15 = vsel %vm2691_vm14, %v2643_v36, %v2739_v25  ;;  %3216 = vmatmul.mubr.msk.bf16.gmra.mrb[20].mxu0 %vm2274_vm11, %v2229_v30 }
 0x219   : > { %2811 = vst [vmem:[%s5050_s13 + $0x28] sm:$0xff] %v2763_v34  ;;  %2835 = vst [vmem:[%s5050_s13 + $0xe8] sm:$0xff] %v2787_v15 }
 0x240   : > { %v3229_v22 = vpop.f32.mrb[8].mxu1 }
 0x241   : > { %v2593_v20 = vmul.f32 %v3229_v22, %v5008_v5  ;;  %v2489_v40 = vpop.f32.mrb[9].mxu1  ;;  %v3205_v42 = vpop.f32.mrb[8].mxu0 }
 0x242   : > { %v2591_v6 = vmul.f32 %v5008_v5, %v2489_v40  ;;  %v3230_v31 = vpop.f32.mrb[10].mxu1  ;;  %v2569_v44 = vmul.f32 %v3205_v42, %v5008_v5  ;;  %v2393_v61 = vpop.f32.mrb[9].mxu0 }
 0x243   : > { %v2648_v38 = vadd.f32 %v5021_v9, %v2593_v20  ;;  %v2594_v56 = vmul.f32 %v3230_v31, %v5008_v5  ;;  %v2492_v7 = vpop.f32.mrb[11].mxu1  ;;  %v2567_v32 = vmul.f32 %v5008_v5, %v2393_v61  ;;  %v3206_v21 = vpop.f32.mrb[10].mxu0 }
 0x244   : > { %v2646_v47 = vadd.f32 %v5021_v9, %v2591_v6  ;;  %v2592_v0 = vmul.f32 %v5008_v5, %v2492_v7  ;;  %v2624_v37 = vadd.f32 %v5021_v9, %v2569_v44  ;;  %v2570_v4 = vmul.f32 %v3206_v21, %v5008_v5  ;;  %v2396_v60 = vpop.f32.mrb[11].mxu0 }
 0x245   : > { %vm2696_vm9 = vcmp.ge.f32.partialorder %v2648_v38, 0.0  ;;  %v2744_v14 = vmul.f32 0.2, %v2648_v38  ;;  %v2622_v29 = vadd.f32 %v5021_v9, %v2567_v32  ;;  %v2649_v49 = vadd.f32 %v5021_v9, %v2594_v56 }
 0x246   : > { %vm2694_vm10 = vcmp.ge.f32.partialorder %v2646_v47, 0.0  ;;  %v2742_v24 = vmul.f32 0.2, %v2646_v47  ;;  %vm2672_vm11 = vcmp.ge.f32.partialorder %v2624_v37, 0.0  ;;  %v2720_v8 = vmul.f32 0.2, %v2624_v37 }
 0x247   : > { %v2792_v57 = vsel %vm2696_vm9, %v2648_v38, %v2744_v14  ;;  %v2625_v19 = vadd.f32 %v5021_v9, %v2570_v4  ;;  %vm2670_vm15 = vcmp.ge.f32.partialorder %v2622_v29, 0.0  ;;  %v2718_v33 = vmul.f32 0.2, %v2622_v29 }
 0x248   : > { %2840 = vst [vmem:[%s5050_s13 + $0x110] sm:$0xff] %v2792_v57  ;;  %v2790_v23 = vsel %vm2694_vm10, %v2646_v47, %v2742_v24  ;;  %vm2697_vm0 = vcmp.ge.f32.partialorder %v2649_v49, 0.0  ;;  %v2768_v13 = vsel %vm2672_vm11, %v2624_v37, %v2720_v8  ;;  %v2745_v48 = vmul.f32 0.2, %v2649_v49 }
 0x249   : > { %2838 = vst [vmem:[%s5050_s13 + $0x100] sm:$0xff] %v2790_v23  ;;  %vm2673_vm1 = vcmp.ge.f32.partialorder %v2625_v19, 0.0  ;;  %v2721_v39 = vmul.f32 0.2, %v2625_v19  ;;  %2816 = vst [vmem:[%s5050_s13 + $0x50] sm:$0xff] %v2768_v13  ;;  %v2766_v28 = vsel %vm2670_vm15, %v2622_v29, %v2718_v33  ;;  %v2568_v43 = vmul.f32 %v5008_v5, %v2396_v60 }
 0x24a   : > { %v2647_v16 = vadd.f32 %v5021_v9, %v2592_v0  ;;  %2814 = vst [vmem:[%s5050_s13 + $0x40] sm:$0xff] %v2766_v28  ;;  %v2793_v45 = vsel %vm2697_vm0, %v2649_v49, %v2745_v48 }
 0x24b   : > { %v2769_v41 = vsel %vm2673_vm1, %v2625_v19, %v2721_v39  ;;  %2841 = vst [vmem:[%s5050_s13 + $0x118] sm:$0xff] %v2793_v45  ;;  %v2623_v58 = vadd.f32 %v5021_v9, %v2568_v43 }
 0x24c   : > { %2817 = vst [vmem:[%s5050_s13 + $0x58] sm:$0xff] %v2769_v41  ;;  %vm2695_vm2 = vcmp.ge.f32.partialorder %v2647_v16, 0.0  ;;  %v2743_v3 = vmul.f32 0.2, %v2647_v16 }
 0x24d   : > { %vm2671_vm12 = vcmp.ge.f32.partialorder %v2623_v58, 0.0  ;;  %v2719_v59 = vmul.f32 0.2, %v2623_v58 }
 0x24e   : > { %v2791_v54 = vsel %vm2695_vm2, %v2647_v16, %v2743_v3 }
 0x24f   : > { %2839 = vst [vmem:[%s5050_s13 + $0x108] sm:$0xff] %v2791_v54  ;;  %v2767_v51 = vsel %vm2671_vm12, %v2623_v58, %v2719_v59 }
 0x250   : > { %2815 = vst [vmem:[%s5050_s13 + $0x48] sm:$0xff] %v2767_v51 }
 0x278   : > { %v3233_v52 = vpop.f32.mrb[12].mxu1 }
 0x279   : > { %v2597_v63 = vmul.f32 %v3233_v52, %v5008_v5  ;;  %v2505_v27 = vpop.f32.mrb[13].mxu1  ;;  %v3209_v26 = vpop.f32.mrb[12].mxu0 }
 0x27a   : > { %v2595_v12 = vmul.f32 %v5008_v5, %v2505_v27  ;;  %v3234_v50 = vpop.f32.mrb[14].mxu1  ;;  %v2573_v55 = vmul.f32 %v3209_v26, %v5008_v5  ;;  %v2409_v35 = vpop.f32.mrb[13].mxu0 }
 0x27b   : > { %v2652_v46 = vadd.f32 %v5021_v9, %v2597_v63  ;;  %v2598_v18 = vmul.f32 %v3234_v50, %v5008_v5  ;;  %v2508_v62 = vpop.f32.mrb[15].mxu1  ;;  %v2571_v2 = vmul.f32 %v5008_v5, %v2409_v35  ;;  %v3210_v36 = vpop.f32.mrb[14].mxu0 }
 0x27c   : > { %v2650_v10 = vadd.f32 %v5021_v9, %v2595_v12  ;;  %v2596_v1 = vmul.f32 %v5008_v5, %v2508_v62  ;;  %v2628_v11 = vadd.f32 %v5021_v9, %v2573_v55  ;;  %v2574_v17 = vmul.f32 %v3210_v36, %v5008_v5  ;;  %v2412_v25 = vpop.f32.mrb[15].mxu0 }
 0x27d   : > { %vm2700_vm3 = vcmp.ge.f32.partialorder %v2652_v46, 0.0  ;;  %v2748_v53 = vmul.f32 0.2, %v2652_v46  ;;  %v2626_v30 = vadd.f32 %v5021_v9, %v2571_v2  ;;  %v2653_v15 = vadd.f32 %v5021_v9, %v2598_v18 }
 0x27e   : > { %vm2698_vm4 = vcmp.ge.f32.partialorder %v2650_v10, 0.0  ;;  %v2746_v34 = vmul.f32 0.2, %v2650_v10  ;;  %vm2676_vm5 = vcmp.ge.f32.partialorder %v2628_v11, 0.0  ;;  %v2724_v22 = vmul.f32 0.2, %v2628_v11 }
 0x27f   : > { %v2796_v20 = vsel %vm2700_vm3, %v2652_v46, %v2748_v53  ;;  %v2629_v40 = vadd.f32 %v5021_v9, %v2574_v17  ;;  %vm2674_vm6 = vcmp.ge.f32.partialorder %v2626_v30, 0.0  ;;  %v2722_v42 = vmul.f32 0.2, %v2626_v30 }
 0x280   : > { %2844 = vst [vmem:[%s5050_s13 + $0x130] sm:$0xff] %v2796_v20  ;;  %v2794_v6 = vsel %vm2698_vm4, %v2650_v10, %v2746_v34  ;;  %vm2701_vm7 = vcmp.ge.f32.partialorder %v2653_v15, 0.0  ;;  %v2772_v31 = vsel %vm2676_vm5, %v2628_v11, %v2724_v22  ;;  %v2749_v38 = vmul.f32 0.2, %v2653_v15 }
 0x281   : > { %2842 = vst [vmem:[%s5050_s13 + $0x120] sm:$0xff] %v2794_v6  ;;  %vm2677_vm8 = vcmp.ge.f32.partialorder %v2629_v40, 0.0  ;;  %v2725_v44 = vmul.f32 0.2, %v2629_v40  ;;  %2820 = vst [vmem:[%s5050_s13 + $0x70] sm:$0xff] %v2772_v31  ;;  %v2770_v61 = vsel %vm2674_vm6, %v2626_v30, %v2722_v42  ;;  %v2572_v56 = vmul.f32 %v5008_v5, %v2412_v25 }
 0x282   : > { %v2651_v7 = vadd.f32 %v5021_v9, %v2596_v1  ;;  %2818 = vst [vmem:[%s5050_s13 + $0x60] sm:$0xff] %v2770_v61  ;;  %v2797_v47 = vsel %vm2701_vm7, %v2653_v15, %v2749_v38 }
 0x283   : > { %v2773_v32 = vsel %vm2677_vm8, %v2629_v40, %v2725_v44  ;;  %2845 = vst [vmem:[%s5050_s13 + $0x138] sm:$0xff] %v2797_v47  ;;  %v2627_v21 = vadd.f32 %v5021_v9, %v2572_v56 }
 0x284   : > { %2821 = vst [vmem:[%s5050_s13 + $0x78] sm:$0xff] %v2773_v32  ;;  %vm2699_vm13 = vcmp.ge.f32.partialorder %v2651_v7, 0.0  ;;  %v2747_v0 = vmul.f32 0.2, %v2651_v7 }
 0x285   : > { %vm2675_vm14 = vcmp.ge.f32.partialorder %v2627_v21, 0.0  ;;  %v2723_v37 = vmul.f32 0.2, %v2627_v21 }
 0x286   : > { %v2795_v14 = vsel %vm2699_vm13, %v2651_v7, %v2747_v0 }
 0x287   : > { %2843 = vst [vmem:[%s5050_s13 + $0x128] sm:$0xff] %v2795_v14  ;;  %v2771_v4 = vsel %vm2675_vm14, %v2627_v21, %v2723_v37 }
 0x288   : > { %2819 = vst [vmem:[%s5050_s13 + $0x68] sm:$0xff] %v2771_v4 }
 0x2b3   : > { %v3213_v60 = vpop.f32.mrb[16].mxu0  ;;  %v3237_v29 = vpop.f32.mrb[16].mxu1 }
 0x2b4   : > { %v2577_v24 = vmul.f32 %v3213_v60, %v5008_v5  ;;  %v2601_v49 = vmul.f32 %v3237_v29, %v5008_v5  ;;  %v2425_v8 = vpop.f32.mrb[17].mxu0  ;;  %v2521_v57 = vpop.f32.mrb[17].mxu1 }
 0x2b5   : > { %v2575_v19 = vmul.f32 %v5008_v5, %v2425_v8  ;;  %v2599_v33 = vmul.f32 %v5008_v5, %v2521_v57  ;;  %v3214_v23 = vpop.f32.mrb[18].mxu0  ;;  %v3238_v13 = vpop.f32.mrb[18].mxu1 }
 0x2b6   : > { %v2632_v39 = vadd.f32 %v5021_v9, %v2577_v24  ;;  %v2656_v48 = vadd.f32 %v5021_v9, %v2601_v49  ;;  %v2578_v28 = vmul.f32 %v3214_v23, %v5008_v5  ;;  %v2602_v43 = vmul.f32 %v3238_v13, %v5008_v5  ;;  %v2428_v16 = vpop.f32.mrb[19].mxu0  ;;  %v2524_v41 = vpop.f32.mrb[19].mxu1 }
 0x2b7   : > { %v2630_v45 = vadd.f32 %v5021_v9, %v2575_v19  ;;  %v2654_v58 = vadd.f32 %v5021_v9, %v2599_v33  ;;  %v2576_v3 = vmul.f32 %v5008_v5, %v2428_v16  ;;  %v2600_v59 = vmul.f32 %v5008_v5, %v2524_v41 }
 0x2b8   : > { %vm2680_vm9 = vcmp.ge.f32.partialorder %v2632_v39, 0.0  ;;  %v2728_v54 = vmul.f32 0.2, %v2632_v39  ;;  %vm2704_vm10 = vcmp.ge.f32.partialorder %v2656_v48, 0.0  ;;  %v2752_v51 = vmul.f32 0.2, %v2656_v48 }
 0x2b9   : > { %vm2678_vm11 = vcmp.ge.f32.partialorder %v2630_v45, 0.0  ;;  %v2726_v52 = vmul.f32 0.2, %v2630_v45  ;;  %vm2702_vm15 = vcmp.ge.f32.partialorder %v2654_v58, 0.0  ;;  %v2750_v63 = vmul.f32 0.2, %v2654_v58 }
 0x2ba   : > { %v2776_v27 = vsel %vm2680_vm9, %v2632_v39, %v2728_v54  ;;  %v2800_v26 = vsel %vm2704_vm10, %v2656_v48, %v2752_v51  ;;  %v2633_v12 = vadd.f32 %v5021_v9, %v2578_v28  ;;  %v2657_v50 = vadd.f32 %v5021_v9, %v2602_v43 }
 0x2bb   : > { %2824 = vst [vmem:[%s5050_s13 + $0x90] sm:$0xff] %v2776_v27  ;;  %2848 = vst [vmem:[%s5050_s13 + $0x150] sm:$0xff] %v2800_v26  ;;  %v2774_v55 = vsel %vm2678_vm11, %v2630_v45, %v2726_v52  ;;  %v2798_v46 = vsel %vm2702_vm15, %v2654_v58, %v2750_v63  ;;  %v2631_v35 = vadd.f32 %v5021_v9, %v2576_v3 }
 0x2bc   : > { %v2655_v18 = vadd.f32 %v5021_v9, %v2600_v59  ;;  %2822 = vst [vmem:[%s5050_s13 + $0x80] sm:$0xff] %v2774_v55  ;;  %2846 = vst [vmem:[%s5050_s13 + $0x140] sm:$0xff] %v2798_v46  ;;  %vm2681_vm0 = vcmp.ge.f32.partialorder %v2633_v12, 0.0  ;;  %v2729_v62 = vmul.f32 0.2, %v2633_v12  ;;  %vm2705_vm1 = vcmp.ge.f32.partialorder %v2657_v50, 0.0 }
 0x2bd   : > { %v2753_v2 = vmul.f32 0.2, %v2657_v50  ;;  %vm2679_vm2 = vcmp.ge.f32.partialorder %v2631_v35, 0.0  ;;  %v2727_v10 = vmul.f32 0.2, %v2631_v35 }
 0x2be   : > { %vm2703_vm12 = vcmp.ge.f32.partialorder %v2655_v18, 0.0  ;;  %v2751_v36 = vmul.f32 0.2, %v2655_v18  ;;  %v2777_v1 = vsel %vm2681_vm0, %v2633_v12, %v2729_v62 }
 0x2bf   : > { %v2801_v11 = vsel %vm2705_vm1, %v2657_v50, %v2753_v2  ;;  %2825 = vst [vmem:[%s5050_s13 + $0x98] sm:$0xff] %v2777_v1  ;;  %v2775_v53 = vsel %vm2679_vm2, %v2631_v35, %v2727_v10 }
 0x2c0   : > { %2849 = vst [vmem:[%s5050_s13 + $0x158] sm:$0xff] %v2801_v11  ;;  %v2799_v17 = vsel %vm2703_vm12, %v2655_v18, %v2751_v36  ;;  %2823 = vst [vmem:[%s5050_s13 + $0x88] sm:$0xff] %v2775_v53 }
 0x2c1   : > { %2847 = vst [vmem:[%s5050_s13 + $0x148] sm:$0xff] %v2799_v17 }
 0x2e8   : > { %v3241_v25 = vpop.f32.mrb[20].mxu1 }
 0x2e9   : > { %v2605_v30 = vmul.f32 %v3241_v25, %v5008_v5  ;;  %v2537_v34 = vpop.f32.mrb[21].mxu1 }
 0x2ea   : > { %v2603_v15 = vmul.f32 %v5008_v5, %v2537_v34  ;;  %v3242_v22 = vpop.f32.mrb[22].mxu1 }
 0x2eb   : > { %v3217_v20 = vpop.f32.mrb[20].mxu0  ;;  %v2660_v40 = vadd.f32 %v5021_v9, %v2605_v30  ;;  %v2606_v42 = vmul.f32 %v3242_v22, %v5008_v5  ;;  %v2540_v6 = vpop.f32.mrb[23].mxu1 }
 0x2ec   : > { %v2581_v31 = vmul.f32 %v3217_v20, %v5008_v5  ;;  %v2441_v44 = vpop.f32.mrb[21].mxu0  ;;  %v2658_v38 = vadd.f32 %v5021_v9, %v2603_v15  ;;  %v2604_v61 = vmul.f32 %v5008_v5, %v2540_v6 }
 0x2ed   : > { %vm2708_vm3 = vcmp.ge.f32.partialorder %v2660_v40, 0.0  ;;  %v2756_v56 = vmul.f32 0.2, %v2660_v40  ;;  %v2579_v7 = vmul.f32 %v5008_v5, %v2441_v44  ;;  %v3218_v32 = vpop.f32.mrb[22].mxu0  ;;  %v2661_v47 = vadd.f32 %v5021_v9, %v2606_v42 }
 0x2ee   : > { %v2636_v21 = vadd.f32 %v5021_v9, %v2581_v31  ;;  %vm2706_vm4 = vcmp.ge.f32.partialorder %v2658_v38, 0.0  ;;  %v2754_v0 = vmul.f32 0.2, %v2658_v38  ;;  %v2582_v37 = vmul.f32 %v3218_v32, %v5008_v5  ;;  %v2444_v14 = vpop.f32.mrb[23].mxu0 }
 0x2ef   : > { %v2804_v4 = vsel %vm2708_vm3, %v2660_v40, %v2756_v56  ;;  %v2634_v60 = vadd.f32 %v5021_v9, %v2579_v7  ;;  %vm2709_vm5 = vcmp.ge.f32.partialorder %v2661_v47, 0.0  ;;  %v2757_v29 = vmul.f32 0.2, %v2661_v47 }
 0x2f0   : > { %vm2684_vm6 = vcmp.ge.f32.partialorder %v2636_v21, 0.0  ;;  %v2732_v24 = vmul.f32 0.2, %v2636_v21  ;;  %2852 = vst [vmem:[%s5050_s13 + $0x170] sm:$0xff] %v2804_v4  ;;  %v2802_v49 = vsel %vm2706_vm4, %v2658_v38, %v2754_v0  ;;  %v2637_v8 = vadd.f32 %v5021_v9, %v2582_v37 }
 0x2f1   : > { %vm2682_vm7 = vcmp.ge.f32.partialorder %v2634_v60, 0.0  ;;  %v2730_v57 = vmul.f32 0.2, %v2634_v60  ;;  %2850 = vst [vmem:[%s5050_s13 + $0x160] sm:$0xff] %v2802_v49  ;;  %v2805_v19 = vsel %vm2709_vm5, %v2661_v47, %v2757_v29  ;;  %v2580_v33 = vmul.f32 %v5008_v5, %v2444_v14 }
 0x2f2   : > { %v2780_v23 = vsel %vm2684_vm6, %v2636_v21, %v2732_v24  ;;  %vm2685_vm8 = vcmp.ge.f32.partialorder %v2637_v8, 0.0  ;;  %v2733_v13 = vmul.f32 0.2, %v2637_v8  ;;  %2853 = vst [vmem:[%s5050_s13 + $0x178] sm:$0xff] %v2805_v19  ;;  %v2659_v39 = vadd.f32 %v5021_v9, %v2604_v61 }
 0x2f3   : > { %2828 = vst [vmem:[%s5050_s13 + $0xb0] sm:$0xff] %v2780_v23  ;;  %v2778_v48 = vsel %vm2682_vm7, %v2634_v60, %v2730_v57  ;;  %v2635_v28 = vadd.f32 %v5021_v9, %v2580_v33 }
 0x2f4   : > { %2826 = vst [vmem:[%s5050_s13 + $0xa0] sm:$0xff] %v2778_v48  ;;  %v2781_v43 = vsel %vm2685_vm8, %v2637_v8, %v2733_v13  ;;  %vm2707_vm13 = vcmp.ge.f32.partialorder %v2659_v39, 0.0  ;;  %v2755_v5 = vmul.f32 0.2, %v2659_v39 }
 0x2f5   : > { %2829 = vst [vmem:[%s5050_s13 + $0xb8] sm:$0xff] %v2781_v43  ;;  %vm2683_vm14 = vcmp.ge.f32.partialorder %v2635_v28, 0.0  ;;  %v2731_v16 = vmul.f32 0.2, %v2635_v28 }
 0x2f6   : > { %v2803_v41 = vsel %vm2707_vm13, %v2659_v39, %v2755_v5 }
 0x2f7   : > { %v2779_v9 = vsel %vm2683_vm14, %v2635_v28, %v2731_v16  ;;  %2851 = vst [vmem:[%s5050_s13 + $0x168] sm:$0xff] %v2803_v41 }
 0x2f8   : > { %2827 = vst [vmem:[%s5050_s13 + $0xa8] sm:$0xff] %v2779_v9 }
 0x2f9   : > { %3436 = shalt.err (!%p3433_p5)
}
 0x2fa   : > { %s3437_s6 = scalar_lea.hbm %s5237_s24, 6144  ;;  %s3441_s11 = scalar_lea.hbm %s5296_s4, 12288 }
 0x2fb   : > { %p3438_p6 = scmp.ne.s32.totalorder %s5237_s24, %s3437_s6  ;;  %p3442_p10 = scmp.lt.u32.totalorder %s5237_s24, %s5296_s4 }
 0x2fc   : > { %p3443_p11 = scmp.lt.u32.totalorder %s3441_s11, %s3437_s6  ;;  %p3445_p13 = scmp.lt.u32.totalorder %s3437_s6, %s5237_s24 }
 0x2fd   : > { %p3439_p7 = pnand %p3438_p6, %p3578_p4 }
 0x2fe   : > { %p3444_p12 = por %p3443_p11, %p3442_p10 }
 0x2ff   : > { %p3440_p9 = pneg %p3439_p7 }
 0x300   : > { %p3446_p0 = por %p3445_p13, %p3444_p12 }
 0x302   : > { %p3447_p1 = pnand %p3446_p0, %p3440_p9 }
 0x304   : > { %3450 = shalt.err (!%p3447_p1)
}
 0x305   : > { %s3512_s14 = smov 128  }
 0x306   : > { %3253 = dma.vmem_to_hbm [thread:$0]  (%p3578_p4), %s5239_s21, 6144, %s5237_s24, %s5245_s26, %s3512_s14, %s3512_s14, %s3504_s9  }
 0x307 PF: > { %p3259_p2 = scmp.ge.s32.totalorder %s3501_s20, 2  ;;  %s2884_s18 = sand.u32 1, %s3481_s15  }
 0x308   : > { %s2885_s22 = scalar_lea.sflag [#allocation3], %s2884_s18 }
 0x309   : > { %p3256_p3 = pnand %p3259_p2, %p3585_p8 }
 0x30b   : > { %3476 = dma.done.wait (!%p3256_p3), %s2885_s22, 6144  }
 0x30c   : > { %3478 = vsyncadd (!%p3256_p3), %s2885_s22, 4294961152  ;;  %s17_s20 = sadd.s32 1, %s3501_s20   ;;  %s5364_s15 = smov %s3485_s16 }
 0x30d   : > { %p14_p5 = scmp.ge.s32.totalorder %s17_s20, 4   ;;  %s5365_s16 = smov %s3489_s17 }
 0x30e   : > { %s5366_s17 = smov %s3591_s28  ;;  %s5367_s18 = smov %s3497_s19 }
 0x30f   : > { %s5368_s19 = smov %s5370_s23  ;;  %16 = sbr.rel (!%p14_p5) target bundleno = 4 (0x4), region = 74 }
 0x316   :  { %2890 = vsyncpa [#allocation3], 1 }
 0x317   :  { %2892 = vsyncpa [#allocation3 + $0x1], 1 }

</bundles_post_ra>
